<compile_context>
chip_gen: v7x
topology: tpu7x:2x2x1
jax: 0.10.0
libtpu: 0.0.40
codegen_flags: <defaults>
</compile_context>

<pallas_src>
import jax
import jax.numpy as jnp
from jax.experimental import pallas as pl
from jax.experimental.pallas import tpu as pltpu

# ----------------------- small synthetic CLIP-vision config -----------------------
BATCH = 2
IN_CH = 3
IMG = 16            # input spatial size
CLIP_SIZE = 16      # stands in for 224 of real CLIP ViT-L/14
PATCH = 8
GRID = CLIP_SIZE // PATCH
NUM_PATCHES = GRID * GRID
TOKENS = NUM_PATCHES + 1     # + CLS token
PATCH_DIM = IN_CH * PATCH * PATCH
HIDDEN = 32
HEADS = 4
HEAD_DIM = HIDDEN // HEADS
LAYERS = 2
INTERMEDIATE = 64
PROJ_DIM = 32                # visual_projection.out_features == embedding_dim
LN_EPS = 1e-5

CLIP_MEAN = jnp.array([0.48145466, 0.4578275, 0.40821073], dtype=jnp.float32)
CLIP_STD = jnp.array([0.26862954, 0.26130258, 0.27577711], dtype=jnp.float32)


# ================================ in-kernel helpers ================================

def _ln(x, g, b, eps=LN_EPS):
    """Row-wise LayerNorm (biased variance, matches torch.nn.LayerNorm)."""
    mean = jnp.mean(x, axis=-1, keepdims=True)
    xc = x - mean
    var = jnp.mean(xc * xc, axis=-1, keepdims=True)
    return xc * jax.lax.rsqrt(var + eps) * g + b


# ================================ the fused Pallas kernel ================================

def _clip_tower_kernel(patch_ref, w_patch_ref, posb_ref, pre_g_ref, pre_b_ref,
                       ln1_g_ref, ln1_b_ref, qkv_w_ref, qkv_b_ref,
                       o_w_ref, o_b_ref, ln2_g_ref, ln2_b_ref,
                       fc1_w_ref, fc1_b_ref, fc2_w_ref, fc2_b_ref,
                       post_g_ref, post_b_ref, vproj_ref, out_ref):
    """Whole CLIP vision tower for one batch element, fully resident in VMEM.

    patch_ref row 0 is an all-zero "patch", so the single embed matmul yields a zero CLS
    row which posb_ref (pos_emb with class_emb pre-added into row 0) then fills in.
    Per-layer weights are stacked on a leading LAYERS axis and indexed statically.
    """
    # ---- patch-embed + cls/pos + pre-LN ----
    x = jnp.dot(patch_ref[0], w_patch_ref[...], preferred_element_type=jnp.float32)
    x = x + posb_ref[...]
    x = _ln(x, pre_g_ref[...], pre_b_ref[...])                 # (T, D)

    # ---- encoder layers (static unrolled loop; LAYERS is small) ----
    for l in range(LAYERS):
        # self-attention block
        xn = _ln(x, ln1_g_ref[l], ln1_b_ref[l])
        # fused QKV projection; 1/sqrt(head_dim) is pre-folded into the Q columns/bias
        qkv = jnp.dot(xn, qkv_w_ref[l], preferred_element_type=jnp.float32) + qkv_b_ref[l]
        o_w = o_w_ref[l]

        attn = jnp.zeros((TOKENS, HIDDEN), jnp.float32)
        for hh in range(HEADS):                                # all heads, static unroll
            lo = hh * HEAD_DIM
            q = qkv[:, lo:lo + HEAD_DIM]                       # (T, hd), already scaled
            k = qkv[:, HIDDEN + lo:HIDDEN + lo + HEAD_DIM]
            v = qkv[:, 2 * HIDDEN + lo:2 * HIDDEN + lo + HEAD_DIM]
            s = jnp.dot(q, k.T, preferred_element_type=jnp.float32)       # (T, T)
            s = s - jnp.max(s, axis=-1, keepdims=True)
            p = jnp.exp(s)
            p = p * pl.reciprocal(jnp.sum(p, axis=-1, keepdims=True), approx=True)
            ah = jnp.dot(p, v, preferred_element_type=jnp.float32)        # (T, hd)
            # concat(heads) @ o_w == sum_h head_h @ o_w[rows of head h]  (no lane concat)
            attn = attn + jnp.dot(ah, o_w[lo:lo + HEAD_DIM, :],
                                  preferred_element_type=jnp.float32)
        x = x + attn + o_b_ref[l]

        # MLP block
        xn2 = _ln(x, ln2_g_ref[l], ln2_b_ref[l])
        m = jnp.dot(xn2, fc1_w_ref[l], preferred_element_type=jnp.float32) + fc1_b_ref[l]
        m = m * jax.nn.sigmoid(1.702 * m)                      # quick_gelu
        m = jnp.dot(m, fc2_w_ref[l], preferred_element_type=jnp.float32) + fc2_b_ref[l]
        x = x + m

    # ---- post-LN on CLS token + visual_projection (no bias) + L2 normalize ----
    cls = x[0:1, :]                                            # (1, D)
    xn = _ln(cls, post_g_ref[...], post_b_ref[...])
    z = jnp.dot(xn, vproj_ref[...], preferred_element_type=jnp.float32)   # (1, P)
    # L2 normalize via rsqrt (EUP slot); no epsilon, matches torch .norm(dim=-1)
    out_ref[0] = z * jax.lax.rsqrt(jnp.sum(z * z, axis=-1, keepdims=True))


# ================================ pallas_call wrapper ================================

def _full_spec(shape):
    return pl.BlockSpec(shape, lambda i: (0,) * len(shape))


def clip_tower(prep, patches_tok):
    B = patches_tok.shape[0]
    return pl.pallas_call(
        _clip_tower_kernel,
        out_shape=jax.ShapeDtypeStruct((B, 1, PROJ_DIM), jnp.float32),
        grid=(B,),
        in_specs=[
            pl.BlockSpec((1, TOKENS, PATCH_DIM), lambda i: (i, 0, 0)),
            _full_spec((PATCH_DIM, HIDDEN)),
            _full_spec((TOKENS, HIDDEN)),
            _full_spec((1, HIDDEN)), _full_spec((1, HIDDEN)),
            _full_spec((LAYERS, 1, HIDDEN)), _full_spec((LAYERS, 1, HIDDEN)),
            _full_spec((LAYERS, HIDDEN, 3 * HIDDEN)), _full_spec((LAYERS, 1, 3 * HIDDEN)),
            _full_spec((LAYERS, HIDDEN, HIDDEN)), _full_spec((LAYERS, 1, HIDDEN)),
            _full_spec((LAYERS, 1, HIDDEN)), _full_spec((LAYERS, 1, HIDDEN)),
            _full_spec((LAYERS, HIDDEN, INTERMEDIATE)), _full_spec((LAYERS, 1, INTERMEDIATE)),
            _full_spec((LAYERS, INTERMEDIATE, HIDDEN)), _full_spec((LAYERS, 1, HIDDEN)),
            _full_spec((1, HIDDEN)), _full_spec((1, HIDDEN)),
            _full_spec((HIDDEN, PROJ_DIM)),
        ],
        out_specs=pl.BlockSpec((1, 1, PROJ_DIM), lambda i: (i, 0, 0)),
        compiler_params=pltpu.CompilerParams(
            dimension_semantics=("parallel",)),
    )(patches_tok,
      prep["w_patch"], prep["pos_bias"], prep["pre_ln_g"], prep["pre_ln_b"],
      prep["ln1_g"], prep["ln1_b"], prep["qkv_w"], prep["qkv_b"],
      prep["o_w"], prep["o_b"], prep["ln2_g"], prep["ln2_b"],
      prep["fc1_w"], prep["fc1_b"], prep["fc2_w"], prep["fc2_b"],
      prep["post_ln_g"], prep["post_ln_b"], prep["visual_proj_w"])


# ================================ parameters ================================

def init_params(key):
    def normal(k, shape, std=0.02):
        return std * jax.random.normal(k, shape, dtype=jnp.float32)

    keys = iter(jax.random.split(key, 256))
    p = {
        "patch_w": normal(next(keys), (HIDDEN, IN_CH, PATCH, PATCH)),   # conv weight, no bias
        "class_emb": normal(next(keys), (HIDDEN,)),
        "pos_emb": normal(next(keys), (TOKENS, HIDDEN)),
        "pre_ln_g": jnp.ones((HIDDEN,), jnp.float32),
        "pre_ln_b": jnp.zeros((HIDDEN,), jnp.float32),
        "post_ln_g": jnp.ones((HIDDEN,), jnp.float32),
        "post_ln_b": jnp.zeros((HIDDEN,), jnp.float32),
        "visual_proj_w": normal(next(keys), (HIDDEN, PROJ_DIM)),        # Linear(D, P, bias=False)
        "layers": [],
    }
    for _ in range(LAYERS):
        lp = {
            "ln1_g": jnp.ones((HIDDEN,), jnp.float32), "ln1_b": jnp.zeros((HIDDEN,), jnp.float32),
            "ln2_g": jnp.ones((HIDDEN,), jnp.float32), "ln2_b": jnp.zeros((HIDDEN,), jnp.float32),
            "q_w": normal(next(keys), (HIDDEN, HIDDEN)), "q_b": jnp.zeros((HIDDEN,), jnp.float32),
            "k_w": normal(next(keys), (HIDDEN, HIDDEN)), "k_b": jnp.zeros((HIDDEN,), jnp.float32),
            "v_w": normal(next(keys), (HIDDEN, HIDDEN)), "v_b": jnp.zeros((HIDDEN,), jnp.float32),
            "o_w": normal(next(keys), (HIDDEN, HIDDEN)), "o_b": jnp.zeros((HIDDEN,), jnp.float32),
            "fc1_w": normal(next(keys), (HIDDEN, INTERMEDIATE)),
            "fc1_b": jnp.zeros((INTERMEDIATE,), jnp.float32),
            "fc2_w": normal(next(keys), (INTERMEDIATE, HIDDEN)),
            "fc2_b": jnp.zeros((HIDDEN,), jnp.float32),
        }
        p["layers"].append(lp)
    return p


def prepare_params(p):
    """One-time repacking (hoisted out of the forward pass):
       - Conv weight flattened to a (C*p*p, D) matmul weight.
       - class_emb folded into pos_emb row 0 (the patch matrix gets a zero CLS row).
       - Q/K/V fused into a single (D, 3D) weight with the 1/sqrt(head_dim) scale
         folded into the Q columns and bias.
       - All 1-D biases / LN params reshaped once to (1, N) kernel-ready layout.
       - Per-layer tensors stacked on a leading LAYERS axis so the fused kernel gets one
         ref per parameter (constant block index across the batch grid -> no re-DMA)."""
    scale = float(HEAD_DIM) ** -0.5
    r2 = lambda v: v.reshape(1, -1).astype(jnp.float32)

    per_layer = []
    for lp in p["layers"]:
        per_layer.append({
            "ln1_g": r2(lp["ln1_g"]), "ln1_b": r2(lp["ln1_b"]),
            "ln2_g": r2(lp["ln2_g"]), "ln2_b": r2(lp["ln2_b"]),
            "qkv_w": jnp.concatenate([lp["q_w"] * scale, lp["k_w"], lp["v_w"]], axis=1),
            "qkv_b": jnp.concatenate([lp["q_b"] * scale, lp["k_b"], lp["v_b"]]).reshape(1, 3 * HIDDEN),
            "o_w": lp["o_w"], "o_b": r2(lp["o_b"]),
            "fc1_w": lp["fc1_w"], "fc1_b": r2(lp["fc1_b"]),
            "fc2_w": lp["fc2_w"], "fc2_b": r2(lp["fc2_b"]),
        })
    stack = lambda name: jnp.stack([lp[name] for lp in per_layer], axis=0)

    prep = {
        "w_patch": p["patch_w"].reshape(HIDDEN, PATCH_DIM).T,       # matches conv flatten order
        "pos_bias": p["pos_emb"].at[0].add(p["class_emb"]),         # (TOKENS, D)
        "pre_ln_g": r2(p["pre_ln_g"]), "pre_ln_b": r2(p["pre_ln_b"]),
        "post_ln_g": r2(p["post_ln_g"]), "post_ln_b": r2(p["post_ln_b"]),
        "visual_proj_w": p["visual_proj_w"],
    }
    for name in ("ln1_g", "ln1_b", "qkv_w", "qkv_b", "o_w", "o_b",
                 "ln2_g", "ln2_b", "fc1_w", "fc1_b", "fc2_w", "fc2_b"):
        prep[name] = stack(name)
    return prep


# ================================ forward (glue + kernel) ================================

def preprocess(x01):
    """torchvision Resize(bicubic, antialias) + CenterCrop + Normalize, on NCHW in [0,1]."""
    B = x01.shape[0]
    # TODO(synk): torchvision bicubic-with-antialias resize is not bit-exact vs jax.image.resize.
    x = jax.image.resize(x01, (B, IN_CH, CLIP_SIZE, CLIP_SIZE), method="bicubic")
    # center crop is identity here since resize target == crop size
    x = (x - CLIP_MEAN.reshape(1, 3, 1, 1)) / CLIP_STD.reshape(1, 3, 1, 1)
    return x


def clip_image_embed(prep, image, value_range=(-1.0, 1.0)):
    """Equivalent of FrozenCLIPImageEmbedder.forward (zero_embedding_radio=0 path)."""
    low, high = value_range
    x = (image - low) / (high - low)
    x = preprocess(x)                                            # (B, 3, S, S)
    B = x.shape[0]

    # patch extraction: Conv2d(3, D, PATCH, stride=PATCH, bias=False) as a patch matmul.
    # Pure layout work, stays in XLA; a zero "CLS patch" row is prepended so the fused
    # kernel produces all TOKENS rows with a single matmul.
    patches = x.reshape(B, IN_CH, GRID, PATCH, GRID, PATCH)
    patches = patches.transpose(0, 2, 4, 1, 3, 5).reshape(B, NUM_PATCHES, PATCH_DIM)
    patches_tok = jnp.concatenate(
        [jnp.zeros((B, 1, PATCH_DIM), jnp.float32), patches], axis=1)

    # single fused kernel: embed + all encoder layers + post-LN/projection/L2-norm.
    # output is already (B, 1, PROJ_DIM) == z.unsqueeze(-2); num_projection_vector=0 and
    # zero_embedding_radio=0 in the default forward, so those branches are not taken.
    return clip_tower(prep, patches_tok)


# ================================ main ================================

if __name__ == "__main__":
    key = jax.random.PRNGKey(0)
    pkey, xkey = jax.random.split(key)
    params = prepare_params(init_params(pkey))

    image = jax.random.uniform(xkey, (BATCH, IN_CH, IMG, IMG),
                               minval=-1.0, maxval=1.0, dtype=jnp.float32)

    fwd = jax.jit(lambda img: clip_image_embed(params, img))
    z = jax.block_until_ready(fwd(image))

    assert z.shape == (BATCH, 1, PROJ_DIM), z.shape
    assert z.dtype == jnp.float32
    assert bool(jnp.all(jnp.isfinite(z)))
    # L2-normalized rows should have (approximately) unit norm
    norms = jnp.linalg.norm(z[:, 0, :], axis=-1)
    assert bool(jnp.all(jnp.abs(norms - 1.0) < 1e-2)), norms
    print("KERNEL_OK")
</pallas_src>

<mosaic_0001>
module attributes {stable_mosaic.version = 11 : i64} {
  func.func @_clip_tower_kernel(%arg0: i32, %arg1: memref<1x5x192xf32, #tpu.memory_space<vmem>>, %arg2: memref<192x32xf32, #tpu.memory_space<vmem>>, %arg3: memref<5x32xf32, #tpu.memory_space<vmem>>, %arg4: memref<1x32xf32, #tpu.memory_space<vmem>>, %arg5: memref<1x32xf32, #tpu.memory_space<vmem>>, %arg6: memref<2x1x32xf32, #tpu.memory_space<vmem>>, %arg7: memref<2x1x32xf32, #tpu.memory_space<vmem>>, %arg8: memref<2x32x96xf32, #tpu.memory_space<vmem>>, %arg9: memref<2x1x96xf32, #tpu.memory_space<vmem>>, %arg10: memref<2x32x32xf32, #tpu.memory_space<vmem>>, %arg11: memref<2x1x32xf32, #tpu.memory_space<vmem>>, %arg12: memref<2x1x32xf32, #tpu.memory_space<vmem>>, %arg13: memref<2x1x32xf32, #tpu.memory_space<vmem>>, %arg14: memref<2x32x64xf32, #tpu.memory_space<vmem>>, %arg15: memref<2x1x64xf32, #tpu.memory_space<vmem>>, %arg16: memref<2x64x32xf32, #tpu.memory_space<vmem>>, %arg17: memref<2x1x32xf32, #tpu.memory_space<vmem>>, %arg18: memref<1x32xf32, #tpu.memory_space<vmem>>, %arg19: memref<1x32xf32, #tpu.memory_space<vmem>>, %arg20: memref<32x32xf32, #tpu.memory_space<vmem>>, %arg21: memref<1x1x32xf32, #tpu.memory_space<vmem>>) attributes {dimension_semantics = [#tpu.dimension_semantics<parallel>], iteration_bounds = array<i64: 2>, scalar_prefetch = 0 : i64, scratch_operands = 0 : i64, tpu.core_type = #tpu.core_type<tc>, window_params = [{transform_indices = @transform_0, window_bounds = array<i64: 1, 5, 192>}, {pipeline_mode = #tpu.pipeline_mode<synchronous>, transform_indices = @transform_1, window_bounds = array<i64: 192, 32>}, {pipeline_mode = #tpu.pipeline_mode<synchronous>, transform_indices = @transform_2, window_bounds = array<i64: 5, 32>}, {pipeline_mode = #tpu.pipeline_mode<synchronous>, transform_indices = @transform_3, window_bounds = array<i64: 1, 32>}, {pipeline_mode = #tpu.pipeline_mode<synchronous>, transform_indices = @transform_4, window_bounds = array<i64: 1, 32>}, {pipeline_mode = #tpu.pipeline_mode<synchronous>, transform_indices = @transform_5, window_bounds = array<i64: 2, 1, 32>}, {pipeline_mode = #tpu.pipeline_mode<synchronous>, transform_indices = @transform_6, window_bounds = array<i64: 2, 1, 32>}, {pipeline_mode = #tpu.pipeline_mode<synchronous>, transform_indices = @transform_7, window_bounds = array<i64: 2, 32, 96>}, {pipeline_mode = #tpu.pipeline_mode<synchronous>, transform_indices = @transform_8, window_bounds = array<i64: 2, 1, 96>}, {pipeline_mode = #tpu.pipeline_mode<synchronous>, transform_indices = @transform_9, window_bounds = array<i64: 2, 32, 32>}, {pipeline_mode = #tpu.pipeline_mode<synchronous>, transform_indices = @transform_10, window_bounds = array<i64: 2, 1, 32>}, {pipeline_mode = #tpu.pipeline_mode<synchronous>, transform_indices = @transform_11, window_bounds = array<i64: 2, 1, 32>}, {pipeline_mode = #tpu.pipeline_mode<synchronous>, transform_indices = @transform_12, window_bounds = array<i64: 2, 1, 32>}, {pipeline_mode = #tpu.pipeline_mode<synchronous>, transform_indices = @transform_13, window_bounds = array<i64: 2, 32, 64>}, {pipeline_mode = #tpu.pipeline_mode<synchronous>, transform_indices = @transform_14, window_bounds = array<i64: 2, 1, 64>}, {pipeline_mode = #tpu.pipeline_mode<synchronous>, transform_indices = @transform_15, window_bounds = array<i64: 2, 64, 32>}, {pipeline_mode = #tpu.pipeline_mode<synchronous>, transform_indices = @transform_16, window_bounds = array<i64: 2, 1, 32>}, {pipeline_mode = #tpu.pipeline_mode<synchronous>, transform_indices = @transform_17, window_bounds = array<i64: 1, 32>}, {pipeline_mode = #tpu.pipeline_mode<synchronous>, transform_indices = @transform_18, window_bounds = array<i64: 1, 32>}, {pipeline_mode = #tpu.pipeline_mode<synchronous>, transform_indices = @transform_19, window_bounds = array<i64: 32, 32>}, {transform_indices = @transform_20, window_bounds = array<i64: 1, 1, 32>}]} {
    %c0 = arith.constant 0 : index
    %c0_0 = arith.constant 0 : index
    %c0_1 = arith.constant 0 : index
    %0 = vector.load %arg1[%c0, %c0_0, %c0_1] : memref<1x5x192xf32, #tpu.memory_space<vmem>>, vector<1x5x192xf32>
    %1 = vector.shape_cast %0 : vector<1x5x192xf32> to vector<5x192xf32>
    %c0_2 = arith.constant 0 : index
    %c0_3 = arith.constant 0 : index
    %2 = vector.load %arg2[%c0_2, %c0_3] : memref<192x32xf32, #tpu.memory_space<vmem>>, vector<192x32xf32>
    %cst = arith.constant dense<0.000000e+00> : vector<5x32xf32>
    %3 = tpu.matmul %1, %2, %cst {dimension_numbers = #tpu.dot_dimension_numbers<[1], [0], [0], [1], [0, 0, 1, 1], [], []>} : vector<5x192xf32>, vector<192x32xf32>, vector<5x32xf32> -> vector<5x32xf32>
    %c0_4 = arith.constant 0 : index
    %c0_5 = arith.constant 0 : index
    %4 = vector.load %arg3[%c0_4, %c0_5] : memref<5x32xf32, #tpu.memory_space<vmem>>, vector<5x32xf32>
    %5 = arith.addf %3, %4 : vector<5x32xf32>
    %c0_6 = arith.constant 0 : index
    %c0_7 = arith.constant 0 : index
    %6 = vector.load %arg4[%c0_6, %c0_7] : memref<1x32xf32, #tpu.memory_space<vmem>>, vector<1x32xf32>
    %c0_8 = arith.constant 0 : index
    %c0_9 = arith.constant 0 : index
    %7 = vector.load %arg5[%c0_8, %c0_9] : memref<1x32xf32, #tpu.memory_space<vmem>>, vector<1x32xf32>
    %cst_10 = arith.constant dense<0.000000e+00> : vector<5xf32>
    %8 = vector.multi_reduction <add>, %5, %cst_10 [1] : vector<5x32xf32> to vector<5xf32>
    %9 = vector.shape_cast %8 : vector<5xf32> to vector<5x1xf32>
    %cst_11 = arith.constant 3.200000e+01 : f32
    %10 = vector.broadcast %cst_11 : f32 to vector<5x1xf32>
    %11 = arith.divf %9, %10 : vector<5x1xf32>
    %12 = vector.broadcast %11 : vector<5x1xf32> to vector<5x32xf32>
    %13 = arith.subf %5, %12 : vector<5x32xf32>
    %14 = arith.mulf %13, %13 : vector<5x32xf32>
    %cst_12 = arith.constant dense<0.000000e+00> : vector<5xf32>
    %15 = vector.multi_reduction <add>, %14, %cst_12 [1] : vector<5x32xf32> to vector<5xf32>
    %16 = vector.shape_cast %15 : vector<5xf32> to vector<5x1xf32>
    %cst_13 = arith.constant 3.200000e+01 : f32
    %17 = vector.broadcast %cst_13 : f32 to vector<5x1xf32>
    %18 = arith.divf %16, %17 : vector<5x1xf32>
    %cst_14 = arith.constant 9.99999974E-6 : f32
    %19 = vector.broadcast %cst_14 : f32 to vector<5x1xf32>
    %20 = arith.addf %18, %19 : vector<5x1xf32>
    %21 = math.rsqrt %20 : vector<5x1xf32>
    %22 = vector.broadcast %21 : vector<5x1xf32> to vector<5x32xf32>
    %23 = arith.mulf %13, %22 : vector<5x32xf32>
    %24 = vector.broadcast %6 : vector<1x32xf32> to vector<5x32xf32>
    %25 = arith.mulf %23, %24 : vector<5x32xf32>
    %26 = vector.broadcast %7 : vector<1x32xf32> to vector<5x32xf32>
    %27 = arith.addf %25, %26 : vector<5x32xf32>
    %c0_15 = arith.constant 0 : index
    %c0_16 = arith.constant 0 : index
    %c0_17 = arith.constant 0 : index
    %28 = vector.load %arg6[%c0_15, %c0_16, %c0_17] : memref<2x1x32xf32, #tpu.memory_space<vmem>>, vector<1x1x32xf32>
    %29 = vector.shape_cast %28 : vector<1x1x32xf32> to vector<1x32xf32>
    %c0_18 = arith.constant 0 : index
    %c0_19 = arith.constant 0 : index
    %c0_20 = arith.constant 0 : index
    %30 = vector.load %arg7[%c0_18, %c0_19, %c0_20] : memref<2x1x32xf32, #tpu.memory_space<vmem>>, vector<1x1x32xf32>
    %31 = vector.shape_cast %30 : vector<1x1x32xf32> to vector<1x32xf32>
    %cst_21 = arith.constant dense<0.000000e+00> : vector<5xf32>
    %32 = vector.multi_reduction <add>, %27, %cst_21 [1] : vector<5x32xf32> to vector<5xf32>
    %33 = vector.shape_cast %32 : vector<5xf32> to vector<5x1xf32>
    %cst_22 = arith.constant 3.200000e+01 : f32
    %34 = vector.broadcast %cst_22 : f32 to vector<5x1xf32>
    %35 = arith.divf %33, %34 : vector<5x1xf32>
    %36 = vector.broadcast %35 : vector<5x1xf32> to vector<5x32xf32>
    %37 = arith.subf %27, %36 : vector<5x32xf32>
    %38 = arith.mulf %37, %37 : vector<5x32xf32>
    %cst_23 = arith.constant dense<0.000000e+00> : vector<5xf32>
    %39 = vector.multi_reduction <add>, %38, %cst_23 [1] : vector<5x32xf32> to vector<5xf32>
    %40 = vector.shape_cast %39 : vector<5xf32> to vector<5x1xf32>
    %cst_24 = arith.constant 3.200000e+01 : f32
    %41 = vector.broadcast %cst_24 : f32 to vector<5x1xf32>
    %42 = arith.divf %40, %41 : vector<5x1xf32>
    %cst_25 = arith.constant 9.99999974E-6 : f32
    %43 = vector.broadcast %cst_25 : f32 to vector<5x1xf32>
    %44 = arith.addf %42, %43 : vector<5x1xf32>
    %45 = math.rsqrt %44 : vector<5x1xf32>
    %46 = vector.broadcast %45 : vector<5x1xf32> to vector<5x32xf32>
    %47 = arith.mulf %37, %46 : vector<5x32xf32>
    %48 = vector.broadcast %29 : vector<1x32xf32> to vector<5x32xf32>
    %49 = arith.mulf %47, %48 : vector<5x32xf32>
    %50 = vector.broadcast %31 : vector<1x32xf32> to vector<5x32xf32>
    %51 = arith.addf %49, %50 : vector<5x32xf32>
    %c0_26 = arith.constant 0 : index
    %c0_27 = arith.constant 0 : index
    %c0_28 = arith.constant 0 : index
    %52 = vector.load %arg8[%c0_26, %c0_27, %c0_28] : memref<2x32x96xf32, #tpu.memory_space<vmem>>, vector<1x32x96xf32>
    %53 = vector.shape_cast %52 : vector<1x32x96xf32> to vector<32x96xf32>
    %cst_29 = arith.constant dense<0.000000e+00> : vector<5x96xf32>
    %54 = tpu.matmul %51, %53, %cst_29 {dimension_numbers = #tpu.dot_dimension_numbers<[1], [0], [0], [1], [0, 0, 1, 1], [], []>} : vector<5x32xf32>, vector<32x96xf32>, vector<5x96xf32> -> vector<5x96xf32>
    %c0_30 = arith.constant 0 : index
    %c0_31 = arith.constant 0 : index
    %c0_32 = arith.constant 0 : index
    %55 = vector.load %arg9[%c0_30, %c0_31, %c0_32] : memref<2x1x96xf32, #tpu.memory_space<vmem>>, vector<1x1x96xf32>
    %56 = vector.shape_cast %55 : vector<1x1x96xf32> to vector<1x96xf32>
    %57 = vector.broadcast %56 : vector<1x96xf32> to vector<5x96xf32>
    %58 = arith.addf %54, %57 : vector<5x96xf32>
    %c0_33 = arith.constant 0 : index
    %c0_34 = arith.constant 0 : index
    %c0_35 = arith.constant 0 : index
    %59 = vector.load %arg10[%c0_33, %c0_34, %c0_35] : memref<2x32x32xf32, #tpu.memory_space<vmem>>, vector<1x32x32xf32>
    %60 = vector.shape_cast %59 : vector<1x32x32xf32> to vector<32x32xf32>
    %cst_36 = arith.constant 0.000000e+00 : f32
    %61 = vector.broadcast %cst_36 : f32 to vector<5x32xf32>
    %62 = vector.extract_strided_slice %58 {offsets = [0, 0], sizes = [5, 8], strides = [1, 1]} : vector<5x96xf32> to vector<5x8xf32>
    %63 = vector.extract_strided_slice %58 {offsets = [0, 32], sizes = [5, 8], strides = [1, 1]} : vector<5x96xf32> to vector<5x8xf32>
    %64 = vector.extract_strided_slice %58 {offsets = [0, 64], sizes = [5, 8], strides = [1, 1]} : vector<5x96xf32> to vector<5x8xf32>
    %65 = tpu.transpose %63, [1, 0] : vector<5x8xf32> -> vector<8x5xf32>
    %cst_37 = arith.constant dense<0.000000e+00> : vector<5x5xf32>
    %66 = tpu.matmul %62, %65, %cst_37 {dimension_numbers = #tpu.dot_dimension_numbers<[1], [0], [0], [1], [0, 0, 1, 1], [], []>} : vector<5x8xf32>, vector<8x5xf32>, vector<5x5xf32> -> vector<5x5xf32>
    %cst_38 = arith.constant dense<0xFF800000> : vector<5xf32>
    %67 = vector.multi_reduction <maximumf>, %66, %cst_38 [1] : vector<5x5xf32> to vector<5xf32>
    %68 = vector.shape_cast %67 : vector<5xf32> to vector<5x1xf32>
    %69 = vector.broadcast %68 : vector<5x1xf32> to vector<5x5xf32>
    %70 = arith.subf %66, %69 : vector<5x5xf32>
    %71 = math.exp %70 : vector<5x5xf32>
    %cst_39 = arith.constant dense<0.000000e+00> : vector<5xf32>
    %72 = vector.multi_reduction <add>, %71, %cst_39 [1] : vector<5x5xf32> to vector<5xf32>
    %73 = vector.shape_cast %72 : vector<5xf32> to vector<5x1xf32>
    %74 = tpu.reciprocal %73 {approx = true} : vector<5x1xf32> -> vector<5x1xf32>
    %75 = vector.broadcast %74 : vector<5x1xf32> to vector<5x5xf32>
    %76 = arith.mulf %71, %75 : vector<5x5xf32>
    %cst_40 = arith.constant dense<0.000000e+00> : vector<5x8xf32>
    %77 = tpu.matmul %76, %64, %cst_40 {dimension_numbers = #tpu.dot_dimension_numbers<[1], [0], [0], [1], [0, 0, 1, 1], [], []>} : vector<5x5xf32>, vector<5x8xf32>, vector<5x8xf32> -> vector<5x8xf32>
    %78 = vector.extract_strided_slice %60 {offsets = [0, 0], sizes = [8, 32], strides = [1, 1]} : vector<32x32xf32> to vector<8x32xf32>
    %cst_41 = arith.constant dense<0.000000e+00> : vector<5x32xf32>
    %79 = tpu.matmul %77, %78, %cst_41 {dimension_numbers = #tpu.dot_dimension_numbers<[1], [0], [0], [1], [0, 0, 1, 1], [], []>} : vector<5x8xf32>, vector<8x32xf32>, vector<5x32xf32> -> vector<5x32xf32>
    %80 = arith.addf %61, %79 : vector<5x32xf32>
    %81 = vector.extract_strided_slice %58 {offsets = [0, 8], sizes = [5, 8], strides = [1, 1]} : vector<5x96xf32> to vector<5x8xf32>
    %82 = vector.extract_strided_slice %58 {offsets = [0, 40], sizes = [5, 8], strides = [1, 1]} : vector<5x96xf32> to vector<5x8xf32>
    %83 = vector.extract_strided_slice %58 {offsets = [0, 72], sizes = [5, 8], strides = [1, 1]} : vector<5x96xf32> to vector<5x8xf32>
    %84 = tpu.transpose %82, [1, 0] : vector<5x8xf32> -> vector<8x5xf32>
    %cst_42 = arith.constant dense<0.000000e+00> : vector<5x5xf32>
    %85 = tpu.matmul %81, %84, %cst_42 {dimension_numbers = #tpu.dot_dimension_numbers<[1], [0], [0], [1], [0, 0, 1, 1], [], []>} : vector<5x8xf32>, vector<8x5xf32>, vector<5x5xf32> -> vector<5x5xf32>
    %cst_43 = arith.constant dense<0xFF800000> : vector<5xf32>
    %86 = vector.multi_reduction <maximumf>, %85, %cst_43 [1] : vector<5x5xf32> to vector<5xf32>
    %87 = vector.shape_cast %86 : vector<5xf32> to vector<5x1xf32>
    %88 = vector.broadcast %87 : vector<5x1xf32> to vector<5x5xf32>
    %89 = arith.subf %85, %88 : vector<5x5xf32>
    %90 = math.exp %89 : vector<5x5xf32>
    %cst_44 = arith.constant dense<0.000000e+00> : vector<5xf32>
    %91 = vector.multi_reduction <add>, %90, %cst_44 [1] : vector<5x5xf32> to vector<5xf32>
    %92 = vector.shape_cast %91 : vector<5xf32> to vector<5x1xf32>
    %93 = tpu.reciprocal %92 {approx = true} : vector<5x1xf32> -> vector<5x1xf32>
    %94 = vector.broadcast %93 : vector<5x1xf32> to vector<5x5xf32>
    %95 = arith.mulf %90, %94 : vector<5x5xf32>
    %cst_45 = arith.constant dense<0.000000e+00> : vector<5x8xf32>
    %96 = tpu.matmul %95, %83, %cst_45 {dimension_numbers = #tpu.dot_dimension_numbers<[1], [0], [0], [1], [0, 0, 1, 1], [], []>} : vector<5x5xf32>, vector<5x8xf32>, vector<5x8xf32> -> vector<5x8xf32>
    %97 = vector.extract_strided_slice %60 {offsets = [8, 0], sizes = [8, 32], strides = [1, 1]} : vector<32x32xf32> to vector<8x32xf32>
    %cst_46 = arith.constant dense<0.000000e+00> : vector<5x32xf32>
    %98 = tpu.matmul %96, %97, %cst_46 {dimension_numbers = #tpu.dot_dimension_numbers<[1], [0], [0], [1], [0, 0, 1, 1], [], []>} : vector<5x8xf32>, vector<8x32xf32>, vector<5x32xf32> -> vector<5x32xf32>
    %99 = arith.addf %80, %98 : vector<5x32xf32>
    %100 = vector.extract_strided_slice %58 {offsets = [0, 16], sizes = [5, 8], strides = [1, 1]} : vector<5x96xf32> to vector<5x8xf32>
    %101 = vector.extract_strided_slice %58 {offsets = [0, 48], sizes = [5, 8], strides = [1, 1]} : vector<5x96xf32> to vector<5x8xf32>
    %102 = vector.extract_strided_slice %58 {offsets = [0, 80], sizes = [5, 8], strides = [1, 1]} : vector<5x96xf32> to vector<5x8xf32>
    %103 = tpu.transpose %101, [1, 0] : vector<5x8xf32> -> vector<8x5xf32>
    %cst_47 = arith.constant dense<0.000000e+00> : vector<5x5xf32>
    %104 = tpu.matmul %100, %103, %cst_47 {dimension_numbers = #tpu.dot_dimension_numbers<[1], [0], [0], [1], [0, 0, 1, 1], [], []>} : vector<5x8xf32>, vector<8x5xf32>, vector<5x5xf32> -> vector<5x5xf32>
    %cst_48 = arith.constant dense<0xFF800000> : vector<5xf32>
    %105 = vector.multi_reduction <maximumf>, %104, %cst_48 [1] : vector<5x5xf32> to vector<5xf32>
    %106 = vector.shape_cast %105 : vector<5xf32> to vector<5x1xf32>
    %107 = vector.broadcast %106 : vector<5x1xf32> to vector<5x5xf32>
    %108 = arith.subf %104, %107 : vector<5x5xf32>
    %109 = math.exp %108 : vector<5x5xf32>
    %cst_49 = arith.constant dense<0.000000e+00> : vector<5xf32>
    %110 = vector.multi_reduction <add>, %109, %cst_49 [1] : vector<5x5xf32> to vector<5xf32>
    %111 = vector.shape_cast %110 : vector<5xf32> to vector<5x1xf32>
    %112 = tpu.reciprocal %111 {approx = true} : vector<5x1xf32> -> vector<5x1xf32>
    %113 = vector.broadcast %112 : vector<5x1xf32> to vector<5x5xf32>
    %114 = arith.mulf %109, %113 : vector<5x5xf32>
    %cst_50 = arith.constant dense<0.000000e+00> : vector<5x8xf32>
    %115 = tpu.matmul %114, %102, %cst_50 {dimension_numbers = #tpu.dot_dimension_numbers<[1], [0], [0], [1], [0, 0, 1, 1], [], []>} : vector<5x5xf32>, vector<5x8xf32>, vector<5x8xf32> -> vector<5x8xf32>
    %116 = vector.extract_strided_slice %60 {offsets = [16, 0], sizes = [8, 32], strides = [1, 1]} : vector<32x32xf32> to vector<8x32xf32>
    %cst_51 = arith.constant dense<0.000000e+00> : vector<5x32xf32>
    %117 = tpu.matmul %115, %116, %cst_51 {dimension_numbers = #tpu.dot_dimension_numbers<[1], [0], [0], [1], [0, 0, 1, 1], [], []>} : vector<5x8xf32>, vector<8x32xf32>, vector<5x32xf32> -> vector<5x32xf32>
    %118 = arith.addf %99, %117 : vector<5x32xf32>
    %119 = vector.extract_strided_slice %58 {offsets = [0, 24], sizes = [5, 8], strides = [1, 1]} : vector<5x96xf32> to vector<5x8xf32>
    %120 = vector.extract_strided_slice %58 {offsets = [0, 56], sizes = [5, 8], strides = [1, 1]} : vector<5x96xf32> to vector<5x8xf32>
    %121 = vector.extract_strided_slice %58 {offsets = [0, 88], sizes = [5, 8], strides = [1, 1]} : vector<5x96xf32> to vector<5x8xf32>
    %122 = tpu.transpose %120, [1, 0] : vector<5x8xf32> -> vector<8x5xf32>
    %cst_52 = arith.constant dense<0.000000e+00> : vector<5x5xf32>
    %123 = tpu.matmul %119, %122, %cst_52 {dimension_numbers = #tpu.dot_dimension_numbers<[1], [0], [0], [1], [0, 0, 1, 1], [], []>} : vector<5x8xf32>, vector<8x5xf32>, vector<5x5xf32> -> vector<5x5xf32>
    %cst_53 = arith.constant dense<0xFF800000> : vector<5xf32>
    %124 = vector.multi_reduction <maximumf>, %123, %cst_53 [1] : vector<5x5xf32> to vector<5xf32>
    %125 = vector.shape_cast %124 : vector<5xf32> to vector<5x1xf32>
    %126 = vector.broadcast %125 : vector<5x1xf32> to vector<5x5xf32>
    %127 = arith.subf %123, %126 : vector<5x5xf32>
    %128 = math.exp %127 : vector<5x5xf32>
    %cst_54 = arith.constant dense<0.000000e+00> : vector<5xf32>
    %129 = vector.multi_reduction <add>, %128, %cst_54 [1] : vector<5x5xf32> to vector<5xf32>
    %130 = vector.shape_cast %129 : vector<5xf32> to vector<5x1xf32>
    %131 = tpu.reciprocal %130 {approx = true} : vector<5x1xf32> -> vector<5x1xf32>
    %132 = vector.broadcast %131 : vector<5x1xf32> to vector<5x5xf32>
    %133 = arith.mulf %128, %132 : vector<5x5xf32>
    %cst_55 = arith.constant dense<0.000000e+00> : vector<5x8xf32>
    %134 = tpu.matmul %133, %121, %cst_55 {dimension_numbers = #tpu.dot_dimension_numbers<[1], [0], [0], [1], [0, 0, 1, 1], [], []>} : vector<5x5xf32>, vector<5x8xf32>, vector<5x8xf32> -> vector<5x8xf32>
    %135 = vector.extract_strided_slice %60 {offsets = [24, 0], sizes = [8, 32], strides = [1, 1]} : vector<32x32xf32> to vector<8x32xf32>
    %cst_56 = arith.constant dense<0.000000e+00> : vector<5x32xf32>
    %136 = tpu.matmul %134, %135, %cst_56 {dimension_numbers = #tpu.dot_dimension_numbers<[1], [0], [0], [1], [0, 0, 1, 1], [], []>} : vector<5x8xf32>, vector<8x32xf32>, vector<5x32xf32> -> vector<5x32xf32>
    %137 = arith.addf %118, %136 : vector<5x32xf32>
    %138 = arith.addf %27, %137 : vector<5x32xf32>
    %c0_57 = arith.constant 0 : index
    %c0_58 = arith.constant 0 : index
    %c0_59 = arith.constant 0 : index
    %139 = vector.load %arg11[%c0_57, %c0_58, %c0_59] : memref<2x1x32xf32, #tpu.memory_space<vmem>>, vector<1x1x32xf32>
    %140 = vector.shape_cast %139 : vector<1x1x32xf32> to vector<1x32xf32>
    %141 = vector.broadcast %140 : vector<1x32xf32> to vector<5x32xf32>
    %142 = arith.addf %138, %141 : vector<5x32xf32>
    %c0_60 = arith.constant 0 : index
    %c0_61 = arith.constant 0 : index
    %c0_62 = arith.constant 0 : index
    %143 = vector.load %arg12[%c0_60, %c0_61, %c0_62] : memref<2x1x32xf32, #tpu.memory_space<vmem>>, vector<1x1x32xf32>
    %144 = vector.shape_cast %143 : vector<1x1x32xf32> to vector<1x32xf32>
    %c0_63 = arith.constant 0 : index
    %c0_64 = arith.constant 0 : index
    %c0_65 = arith.constant 0 : index
    %145 = vector.load %arg13[%c0_63, %c0_64, %c0_65] : memref<2x1x32xf32, #tpu.memory_space<vmem>>, vector<1x1x32xf32>
    %146 = vector.shape_cast %145 : vector<1x1x32xf32> to vector<1x32xf32>
    %cst_66 = arith.constant dense<0.000000e+00> : vector<5xf32>
    %147 = vector.multi_reduction <add>, %142, %cst_66 [1] : vector<5x32xf32> to vector<5xf32>
    %148 = vector.shape_cast %147 : vector<5xf32> to vector<5x1xf32>
    %cst_67 = arith.constant 3.200000e+01 : f32
    %149 = vector.broadcast %cst_67 : f32 to vector<5x1xf32>
    %150 = arith.divf %148, %149 : vector<5x1xf32>
    %151 = vector.broadcast %150 : vector<5x1xf32> to vector<5x32xf32>
    %152 = arith.subf %142, %151 : vector<5x32xf32>
    %153 = arith.mulf %152, %152 : vector<5x32xf32>
    %cst_68 = arith.constant dense<0.000000e+00> : vector<5xf32>
    %154 = vector.multi_reduction <add>, %153, %cst_68 [1] : vector<5x32xf32> to vector<5xf32>
    %155 = vector.shape_cast %154 : vector<5xf32> to vector<5x1xf32>
    %cst_69 = arith.constant 3.200000e+01 : f32
    %156 = vector.broadcast %cst_69 : f32 to vector<5x1xf32>
    %157 = arith.divf %155, %156 : vector<5x1xf32>
    %cst_70 = arith.constant 9.99999974E-6 : f32
    %158 = vector.broadcast %cst_70 : f32 to vector<5x1xf32>
    %159 = arith.addf %157, %158 : vector<5x1xf32>
    %160 = math.rsqrt %159 : vector<5x1xf32>
    %161 = vector.broadcast %160 : vector<5x1xf32> to vector<5x32xf32>
    %162 = arith.mulf %152, %161 : vector<5x32xf32>
    %163 = vector.broadcast %144 : vector<1x32xf32> to vector<5x32xf32>
    %164 = arith.mulf %162, %163 : vector<5x32xf32>
    %165 = vector.broadcast %146 : vector<1x32xf32> to vector<5x32xf32>
    %166 = arith.addf %164, %165 : vector<5x32xf32>
    %c0_71 = arith.constant 0 : index
    %c0_72 = arith.constant 0 : index
    %c0_73 = arith.constant 0 : index
    %167 = vector.load %arg14[%c0_71, %c0_72, %c0_73] : memref<2x32x64xf32, #tpu.memory_space<vmem>>, vector<1x32x64xf32>
    %168 = vector.shape_cast %167 : vector<1x32x64xf32> to vector<32x64xf32>
    %cst_74 = arith.constant dense<0.000000e+00> : vector<5x64xf32>
    %169 = tpu.matmul %166, %168, %cst_74 {dimension_numbers = #tpu.dot_dimension_numbers<[1], [0], [0], [1], [0, 0, 1, 1], [], []>} : vector<5x32xf32>, vector<32x64xf32>, vector<5x64xf32> -> vector<5x64xf32>
    %c0_75 = arith.constant 0 : index
    %c0_76 = arith.constant 0 : index
    %c0_77 = arith.constant 0 : index
    %170 = vector.load %arg15[%c0_75, %c0_76, %c0_77] : memref<2x1x64xf32, #tpu.memory_space<vmem>>, vector<1x1x64xf32>
    %171 = vector.shape_cast %170 : vector<1x1x64xf32> to vector<1x64xf32>
    %172 = vector.broadcast %171 : vector<1x64xf32> to vector<5x64xf32>
    %173 = arith.addf %169, %172 : vector<5x64xf32>
    %cst_78 = arith.constant 1.702000e+00 : f32
    %174 = vector.broadcast %cst_78 : f32 to vector<5x64xf32>
    %175 = arith.mulf %174, %173 : vector<5x64xf32>
    %176 = arith.negf %175 : vector<5x64xf32>
    %177 = math.exp %176 : vector<5x64xf32>
    %cst_79 = arith.constant 1.000000e+00 : f32
    %178 = vector.broadcast %cst_79 : f32 to vector<5x64xf32>
    %179 = arith.addf %178, %177 : vector<5x64xf32>
    %180 = arith.divf %178, %179 : vector<5x64xf32>
    %181 = arith.mulf %173, %180 : vector<5x64xf32>
    %c0_80 = arith.constant 0 : index
    %c0_81 = arith.constant 0 : index
    %c0_82 = arith.constant 0 : index
    %182 = vector.load %arg16[%c0_80, %c0_81, %c0_82] : memref<2x64x32xf32, #tpu.memory_space<vmem>>, vector<1x64x32xf32>
    %183 = vector.shape_cast %182 : vector<1x64x32xf32> to vector<64x32xf32>
    %cst_83 = arith.constant dense<0.000000e+00> : vector<5x32xf32>
    %184 = tpu.matmul %181, %183, %cst_83 {dimension_numbers = #tpu.dot_dimension_numbers<[1], [0], [0], [1], [0, 0, 1, 1], [], []>} : vector<5x64xf32>, vector<64x32xf32>, vector<5x32xf32> -> vector<5x32xf32>
    %c0_84 = arith.constant 0 : index
    %c0_85 = arith.constant 0 : index
    %c0_86 = arith.constant 0 : index
    %185 = vector.load %arg17[%c0_84, %c0_85, %c0_86] : memref<2x1x32xf32, #tpu.memory_space<vmem>>, vector<1x1x32xf32>
    %186 = vector.shape_cast %185 : vector<1x1x32xf32> to vector<1x32xf32>
    %187 = vector.broadcast %186 : vector<1x32xf32> to vector<5x32xf32>
    %188 = arith.addf %184, %187 : vector<5x32xf32>
    %189 = arith.addf %142, %188 : vector<5x32xf32>
    %c1 = arith.constant 1 : index
    %c0_87 = arith.constant 0 : index
    %c0_88 = arith.constant 0 : index
    %190 = vector.load %arg6[%c1, %c0_87, %c0_88] : memref<2x1x32xf32, #tpu.memory_space<vmem>>, vector<1x1x32xf32>
    %191 = vector.shape_cast %190 : vector<1x1x32xf32> to vector<1x32xf32>
    %c1_89 = arith.constant 1 : index
    %c0_90 = arith.constant 0 : index
    %c0_91 = arith.constant 0 : index
    %192 = vector.load %arg7[%c1_89, %c0_90, %c0_91] : memref<2x1x32xf32, #tpu.memory_space<vmem>>, vector<1x1x32xf32>
    %193 = vector.shape_cast %192 : vector<1x1x32xf32> to vector<1x32xf32>
    %cst_92 = arith.constant dense<0.000000e+00> : vector<5xf32>
    %194 = vector.multi_reduction <add>, %189, %cst_92 [1] : vector<5x32xf32> to vector<5xf32>
    %195 = vector.shape_cast %194 : vector<5xf32> to vector<5x1xf32>
    %cst_93 = arith.constant 3.200000e+01 : f32
    %196 = vector.broadcast %cst_93 : f32 to vector<5x1xf32>
    %197 = arith.divf %195, %196 : vector<5x1xf32>
    %198 = vector.broadcast %197 : vector<5x1xf32> to vector<5x32xf32>
    %199 = arith.subf %189, %198 : vector<5x32xf32>
    %200 = arith.mulf %199, %199 : vector<5x32xf32>
    %cst_94 = arith.constant dense<0.000000e+00> : vector<5xf32>
    %201 = vector.multi_reduction <add>, %200, %cst_94 [1] : vector<5x32xf32> to vector<5xf32>
    %202 = vector.shape_cast %201 : vector<5xf32> to vector<5x1xf32>
    %cst_95 = arith.constant 3.200000e+01 : f32
    %203 = vector.broadcast %cst_95 : f32 to vector<5x1xf32>
    %204 = arith.divf %202, %203 : vector<5x1xf32>
    %cst_96 = arith.constant 9.99999974E-6 : f32
    %205 = vector.broadcast %cst_96 : f32 to vector<5x1xf32>
    %206 = arith.addf %204, %205 : vector<5x1xf32>
    %207 = math.rsqrt %206 : vector<5x1xf32>
    %208 = vector.broadcast %207 : vector<5x1xf32> to vector<5x32xf32>
    %209 = arith.mulf %199, %208 : vector<5x32xf32>
    %210 = vector.broadcast %191 : vector<1x32xf32> to vector<5x32xf32>
    %211 = arith.mulf %209, %210 : vector<5x32xf32>
    %212 = vector.broadcast %193 : vector<1x32xf32> to vector<5x32xf32>
    %213 = arith.addf %211, %212 : vector<5x32xf32>
    %c1_97 = arith.constant 1 : index
    %c0_98 = arith.constant 0 : index
    %c0_99 = arith.constant 0 : index
    %214 = vector.load %arg8[%c1_97, %c0_98, %c0_99] : memref<2x32x96xf32, #tpu.memory_space<vmem>>, vector<1x32x96xf32>
    %215 = vector.shape_cast %214 : vector<1x32x96xf32> to vector<32x96xf32>
    %cst_100 = arith.constant dense<0.000000e+00> : vector<5x96xf32>
    %216 = tpu.matmul %213, %215, %cst_100 {dimension_numbers = #tpu.dot_dimension_numbers<[1], [0], [0], [1], [0, 0, 1, 1], [], []>} : vector<5x32xf32>, vector<32x96xf32>, vector<5x96xf32> -> vector<5x96xf32>
    %c1_101 = arith.constant 1 : index
    %c0_102 = arith.constant 0 : index
    %c0_103 = arith.constant 0 : index
    %217 = vector.load %arg9[%c1_101, %c0_102, %c0_103] : memref<2x1x96xf32, #tpu.memory_space<vmem>>, vector<1x1x96xf32>
    %218 = vector.shape_cast %217 : vector<1x1x96xf32> to vector<1x96xf32>
    %219 = vector.broadcast %218 : vector<1x96xf32> to vector<5x96xf32>
    %220 = arith.addf %216, %219 : vector<5x96xf32>
    %c1_104 = arith.constant 1 : index
    %c0_105 = arith.constant 0 : index
    %c0_106 = arith.constant 0 : index
    %221 = vector.load %arg10[%c1_104, %c0_105, %c0_106] : memref<2x32x32xf32, #tpu.memory_space<vmem>>, vector<1x32x32xf32>
    %222 = vector.shape_cast %221 : vector<1x32x32xf32> to vector<32x32xf32>
    %cst_107 = arith.constant 0.000000e+00 : f32
    %223 = vector.broadcast %cst_107 : f32 to vector<5x32xf32>
    %224 = vector.extract_strided_slice %220 {offsets = [0, 0], sizes = [5, 8], strides = [1, 1]} : vector<5x96xf32> to vector<5x8xf32>
    %225 = vector.extract_strided_slice %220 {offsets = [0, 32], sizes = [5, 8], strides = [1, 1]} : vector<5x96xf32> to vector<5x8xf32>
    %226 = vector.extract_strided_slice %220 {offsets = [0, 64], sizes = [5, 8], strides = [1, 1]} : vector<5x96xf32> to vector<5x8xf32>
    %227 = tpu.transpose %225, [1, 0] : vector<5x8xf32> -> vector<8x5xf32>
    %cst_108 = arith.constant dense<0.000000e+00> : vector<5x5xf32>
    %228 = tpu.matmul %224, %227, %cst_108 {dimension_numbers = #tpu.dot_dimension_numbers<[1], [0], [0], [1], [0, 0, 1, 1], [], []>} : vector<5x8xf32>, vector<8x5xf32>, vector<5x5xf32> -> vector<5x5xf32>
    %cst_109 = arith.constant dense<0xFF800000> : vector<5xf32>
    %229 = vector.multi_reduction <maximumf>, %228, %cst_109 [1] : vector<5x5xf32> to vector<5xf32>
    %230 = vector.shape_cast %229 : vector<5xf32> to vector<5x1xf32>
    %231 = vector.broadcast %230 : vector<5x1xf32> to vector<5x5xf32>
    %232 = arith.subf %228, %231 : vector<5x5xf32>
    %233 = math.exp %232 : vector<5x5xf32>
    %cst_110 = arith.constant dense<0.000000e+00> : vector<5xf32>
    %234 = vector.multi_reduction <add>, %233, %cst_110 [1] : vector<5x5xf32> to vector<5xf32>
    %235 = vector.shape_cast %234 : vector<5xf32> to vector<5x1xf32>
    %236 = tpu.reciprocal %235 {approx = true} : vector<5x1xf32> -> vector<5x1xf32>
    %237 = vector.broadcast %236 : vector<5x1xf32> to vector<5x5xf32>
    %238 = arith.mulf %233, %237 : vector<5x5xf32>
    %cst_111 = arith.constant dense<0.000000e+00> : vector<5x8xf32>
    %239 = tpu.matmul %238, %226, %cst_111 {dimension_numbers = #tpu.dot_dimension_numbers<[1], [0], [0], [1], [0, 0, 1, 1], [], []>} : vector<5x5xf32>, vector<5x8xf32>, vector<5x8xf32> -> vector<5x8xf32>
    %240 = vector.extract_strided_slice %222 {offsets = [0, 0], sizes = [8, 32], strides = [1, 1]} : vector<32x32xf32> to vector<8x32xf32>
    %cst_112 = arith.constant dense<0.000000e+00> : vector<5x32xf32>
    %241 = tpu.matmul %239, %240, %cst_112 {dimension_numbers = #tpu.dot_dimension_numbers<[1], [0], [0], [1], [0, 0, 1, 1], [], []>} : vector<5x8xf32>, vector<8x32xf32>, vector<5x32xf32> -> vector<5x32xf32>
    %242 = arith.addf %223, %241 : vector<5x32xf32>
    %243 = vector.extract_strided_slice %220 {offsets = [0, 8], sizes = [5, 8], strides = [1, 1]} : vector<5x96xf32> to vector<5x8xf32>
    %244 = vector.extract_strided_slice %220 {offsets = [0, 40], sizes = [5, 8], strides = [1, 1]} : vector<5x96xf32> to vector<5x8xf32>
    %245 = vector.extract_strided_slice %220 {offsets = [0, 72], sizes = [5, 8], strides = [1, 1]} : vector<5x96xf32> to vector<5x8xf32>
    %246 = tpu.transpose %244, [1, 0] : vector<5x8xf32> -> vector<8x5xf32>
    %cst_113 = arith.constant dense<0.000000e+00> : vector<5x5xf32>
    %247 = tpu.matmul %243, %246, %cst_113 {dimension_numbers = #tpu.dot_dimension_numbers<[1], [0], [0], [1], [0, 0, 1, 1], [], []>} : vector<5x8xf32>, vector<8x5xf32>, vector<5x5xf32> -> vector<5x5xf32>
    %cst_114 = arith.constant dense<0xFF800000> : vector<5xf32>
    %248 = vector.multi_reduction <maximumf>, %247, %cst_114 [1] : vector<5x5xf32> to vector<5xf32>
    %249 = vector.shape_cast %248 : vector<5xf32> to vector<5x1xf32>
    %250 = vector.broadcast %249 : vector<5x1xf32> to vector<5x5xf32>
    %251 = arith.subf %247, %250 : vector<5x5xf32>
    %252 = math.exp %251 : vector<5x5xf32>
    %cst_115 = arith.constant dense<0.000000e+00> : vector<5xf32>
    %253 = vector.multi_reduction <add>, %252, %cst_115 [1] : vector<5x5xf32> to vector<5xf32>
    %254 = vector.shape_cast %253 : vector<5xf32> to vector<5x1xf32>
    %255 = tpu.reciprocal %254 {approx = true} : vector<5x1xf32> -> vector<5x1xf32>
    %256 = vector.broadcast %255 : vector<5x1xf32> to vector<5x5xf32>
    %257 = arith.mulf %252, %256 : vector<5x5xf32>
    %cst_116 = arith.constant dense<0.000000e+00> : vector<5x8xf32>
    %258 = tpu.matmul %257, %245, %cst_116 {dimension_numbers = #tpu.dot_dimension_numbers<[1], [0], [0], [1], [0, 0, 1, 1], [], []>} : vector<5x5xf32>, vector<5x8xf32>, vector<5x8xf32> -> vector<5x8xf32>
    %259 = vector.extract_strided_slice %222 {offsets = [8, 0], sizes = [8, 32], strides = [1, 1]} : vector<32x32xf32> to vector<8x32xf32>
    %cst_117 = arith.constant dense<0.000000e+00> : vector<5x32xf32>
    %260 = tpu.matmul %258, %259, %cst_117 {dimension_numbers = #tpu.dot_dimension_numbers<[1], [0], [0], [1], [0, 0, 1, 1], [], []>} : vector<5x8xf32>, vector<8x32xf32>, vector<5x32xf32> -> vector<5x32xf32>
    %261 = arith.addf %242, %260 : vector<5x32xf32>
    %262 = vector.extract_strided_slice %220 {offsets = [0, 16], sizes = [5, 8], strides = [1, 1]} : vector<5x96xf32> to vector<5x8xf32>
    %263 = vector.extract_strided_slice %220 {offsets = [0, 48], sizes = [5, 8], strides = [1, 1]} : vector<5x96xf32> to vector<5x8xf32>
    %264 = vector.extract_strided_slice %220 {offsets = [0, 80], sizes = [5, 8], strides = [1, 1]} : vector<5x96xf32> to vector<5x8xf32>
    %265 = tpu.transpose %263, [1, 0] : vector<5x8xf32> -> vector<8x5xf32>
    %cst_118 = arith.constant dense<0.000000e+00> : vector<5x5xf32>
    %266 = tpu.matmul %262, %265, %cst_118 {dimension_numbers = #tpu.dot_dimension_numbers<[1], [0], [0], [1], [0, 0, 1, 1], [], []>} : vector<5x8xf32>, vector<8x5xf32>, vector<5x5xf32> -> vector<5x5xf32>
    %cst_119 = arith.constant dense<0xFF800000> : vector<5xf32>
    %267 = vector.multi_reduction <maximumf>, %266, %cst_119 [1] : vector<5x5xf32> to vector<5xf32>
    %268 = vector.shape_cast %267 : vector<5xf32> to vector<5x1xf32>
    %269 = vector.broadcast %268 : vector<5x1xf32> to vector<5x5xf32>
    %270 = arith.subf %266, %269 : vector<5x5xf32>
    %271 = math.exp %270 : vector<5x5xf32>
    %cst_120 = arith.constant dense<0.000000e+00> : vector<5xf32>
    %272 = vector.multi_reduction <add>, %271, %cst_120 [1] : vector<5x5xf32> to vector<5xf32>
    %273 = vector.shape_cast %272 : vector<5xf32> to vector<5x1xf32>
    %274 = tpu.reciprocal %273 {approx = true} : vector<5x1xf32> -> vector<5x1xf32>
    %275 = vector.broadcast %274 : vector<5x1xf32> to vector<5x5xf32>
    %276 = arith.mulf %271, %275 : vector<5x5xf32>
    %cst_121 = arith.constant dense<0.000000e+00> : vector<5x8xf32>
    %277 = tpu.matmul %276, %264, %cst_121 {dimension_numbers = #tpu.dot_dimension_numbers<[1], [0], [0], [1], [0, 0, 1, 1], [], []>} : vector<5x5xf32>, vector<5x8xf32>, vector<5x8xf32> -> vector<5x8xf32>
    %278 = vector.extract_strided_slice %222 {offsets = [16, 0], sizes = [8, 32], strides = [1, 1]} : vector<32x32xf32> to vector<8x32xf32>
    %cst_122 = arith.constant dense<0.000000e+00> : vector<5x32xf32>
    %279 = tpu.matmul %277, %278, %cst_122 {dimension_numbers = #tpu.dot_dimension_numbers<[1], [0], [0], [1], [0, 0, 1, 1], [], []>} : vector<5x8xf32>, vector<8x32xf32>, vector<5x32xf32> -> vector<5x32xf32>
    %280 = arith.addf %261, %279 : vector<5x32xf32>
    %281 = vector.extract_strided_slice %220 {offsets = [0, 24], sizes = [5, 8], strides = [1, 1]} : vector<5x96xf32> to vector<5x8xf32>
    %282 = vector.extract_strided_slice %220 {offsets = [0, 56], sizes = [5, 8], strides = [1, 1]} : vector<5x96xf32> to vector<5x8xf32>
    %283 = vector.extract_strided_slice %220 {offsets = [0, 88], sizes = [5, 8], strides = [1, 1]} : vector<5x96xf32> to vector<5x8xf32>
    %284 = tpu.transpose %282, [1, 0] : vector<5x8xf32> -> vector<8x5xf32>
    %cst_123 = arith.constant dense<0.000000e+00> : vector<5x5xf32>
    %285 = tpu.matmul %281, %284, %cst_123 {dimension_numbers = #tpu.dot_dimension_numbers<[1], [0], [0], [1], [0, 0, 1, 1], [], []>} : vector<5x8xf32>, vector<8x5xf32>, vector<5x5xf32> -> vector<5x5xf32>
    %cst_124 = arith.constant dense<0xFF800000> : vector<5xf32>
    %286 = vector.multi_reduction <maximumf>, %285, %cst_124 [1] : vector<5x5xf32> to vector<5xf32>
    %287 = vector.shape_cast %286 : vector<5xf32> to vector<5x1xf32>
    %288 = vector.broadcast %287 : vector<5x1xf32> to vector<5x5xf32>
    %289 = arith.subf %285, %288 : vector<5x5xf32>
    %290 = math.exp %289 : vector<5x5xf32>
    %cst_125 = arith.constant dense<0.000000e+00> : vector<5xf32>
    %291 = vector.multi_reduction <add>, %290, %cst_125 [1] : vector<5x5xf32> to vector<5xf32>
    %292 = vector.shape_cast %291 : vector<5xf32> to vector<5x1xf32>
    %293 = tpu.reciprocal %292 {approx = true} : vector<5x1xf32> -> vector<5x1xf32>
    %294 = vector.broadcast %293 : vector<5x1xf32> to vector<5x5xf32>
    %295 = arith.mulf %290, %294 : vector<5x5xf32>
    %cst_126 = arith.constant dense<0.000000e+00> : vector<5x8xf32>
    %296 = tpu.matmul %295, %283, %cst_126 {dimension_numbers = #tpu.dot_dimension_numbers<[1], [0], [0], [1], [0, 0, 1, 1], [], []>} : vector<5x5xf32>, vector<5x8xf32>, vector<5x8xf32> -> vector<5x8xf32>
    %297 = vector.extract_strided_slice %222 {offsets = [24, 0], sizes = [8, 32], strides = [1, 1]} : vector<32x32xf32> to vector<8x32xf32>
    %cst_127 = arith.constant dense<0.000000e+00> : vector<5x32xf32>
    %298 = tpu.matmul %296, %297, %cst_127 {dimension_numbers = #tpu.dot_dimension_numbers<[1], [0], [0], [1], [0, 0, 1, 1], [], []>} : vector<5x8xf32>, vector<8x32xf32>, vector<5x32xf32> -> vector<5x32xf32>
    %299 = arith.addf %280, %298 : vector<5x32xf32>
    %300 = arith.addf %189, %299 : vector<5x32xf32>
    %c1_128 = arith.constant 1 : index
    %c0_129 = arith.constant 0 : index
    %c0_130 = arith.constant 0 : index
    %301 = vector.load %arg11[%c1_128, %c0_129, %c0_130] : memref<2x1x32xf32, #tpu.memory_space<vmem>>, vector<1x1x32xf32>
    %302 = vector.shape_cast %301 : vector<1x1x32xf32> to vector<1x32xf32>
    %303 = vector.broadcast %302 : vector<1x32xf32> to vector<5x32xf32>
    %304 = arith.addf %300, %303 : vector<5x32xf32>
    %c1_131 = arith.constant 1 : index
    %c0_132 = arith.constant 0 : index
    %c0_133 = arith.constant 0 : index
    %305 = vector.load %arg12[%c1_131, %c0_132, %c0_133] : memref<2x1x32xf32, #tpu.memory_space<vmem>>, vector<1x1x32xf32>
    %306 = vector.shape_cast %305 : vector<1x1x32xf32> to vector<1x32xf32>
    %c1_134 = arith.constant 1 : index
    %c0_135 = arith.constant 0 : index
    %c0_136 = arith.constant 0 : index
    %307 = vector.load %arg13[%c1_134, %c0_135, %c0_136] : memref<2x1x32xf32, #tpu.memory_space<vmem>>, vector<1x1x32xf32>
    %308 = vector.shape_cast %307 : vector<1x1x32xf32> to vector<1x32xf32>
    %cst_137 = arith.constant dense<0.000000e+00> : vector<5xf32>
    %309 = vector.multi_reduction <add>, %304, %cst_137 [1] : vector<5x32xf32> to vector<5xf32>
    %310 = vector.shape_cast %309 : vector<5xf32> to vector<5x1xf32>
    %cst_138 = arith.constant 3.200000e+01 : f32
    %311 = vector.broadcast %cst_138 : f32 to vector<5x1xf32>
    %312 = arith.divf %310, %311 : vector<5x1xf32>
    %313 = vector.broadcast %312 : vector<5x1xf32> to vector<5x32xf32>
    %314 = arith.subf %304, %313 : vector<5x32xf32>
    %315 = arith.mulf %314, %314 : vector<5x32xf32>
    %cst_139 = arith.constant dense<0.000000e+00> : vector<5xf32>
    %316 = vector.multi_reduction <add>, %315, %cst_139 [1] : vector<5x32xf32> to vector<5xf32>
    %317 = vector.shape_cast %316 : vector<5xf32> to vector<5x1xf32>
    %cst_140 = arith.constant 3.200000e+01 : f32
    %318 = vector.broadcast %cst_140 : f32 to vector<5x1xf32>
    %319 = arith.divf %317, %318 : vector<5x1xf32>
    %cst_141 = arith.constant 9.99999974E-6 : f32
    %320 = vector.broadcast %cst_141 : f32 to vector<5x1xf32>
    %321 = arith.addf %319, %320 : vector<5x1xf32>
    %322 = math.rsqrt %321 : vector<5x1xf32>
    %323 = vector.broadcast %322 : vector<5x1xf32> to vector<5x32xf32>
    %324 = arith.mulf %314, %323 : vector<5x32xf32>
    %325 = vector.broadcast %306 : vector<1x32xf32> to vector<5x32xf32>
    %326 = arith.mulf %324, %325 : vector<5x32xf32>
    %327 = vector.broadcast %308 : vector<1x32xf32> to vector<5x32xf32>
    %328 = arith.addf %326, %327 : vector<5x32xf32>
    %c1_142 = arith.constant 1 : index
    %c0_143 = arith.constant 0 : index
    %c0_144 = arith.constant 0 : index
    %329 = vector.load %arg14[%c1_142, %c0_143, %c0_144] : memref<2x32x64xf32, #tpu.memory_space<vmem>>, vector<1x32x64xf32>
    %330 = vector.shape_cast %329 : vector<1x32x64xf32> to vector<32x64xf32>
    %cst_145 = arith.constant dense<0.000000e+00> : vector<5x64xf32>
    %331 = tpu.matmul %328, %330, %cst_145 {dimension_numbers = #tpu.dot_dimension_numbers<[1], [0], [0], [1], [0, 0, 1, 1], [], []>} : vector<5x32xf32>, vector<32x64xf32>, vector<5x64xf32> -> vector<5x64xf32>
    %c1_146 = arith.constant 1 : index
    %c0_147 = arith.constant 0 : index
    %c0_148 = arith.constant 0 : index
    %332 = vector.load %arg15[%c1_146, %c0_147, %c0_148] : memref<2x1x64xf32, #tpu.memory_space<vmem>>, vector<1x1x64xf32>
    %333 = vector.shape_cast %332 : vector<1x1x64xf32> to vector<1x64xf32>
    %334 = vector.broadcast %333 : vector<1x64xf32> to vector<5x64xf32>
    %335 = arith.addf %331, %334 : vector<5x64xf32>
    %cst_149 = arith.constant 1.702000e+00 : f32
    %336 = vector.broadcast %cst_149 : f32 to vector<5x64xf32>
    %337 = arith.mulf %336, %335 : vector<5x64xf32>
    %338 = arith.negf %337 : vector<5x64xf32>
    %339 = math.exp %338 : vector<5x64xf32>
    %cst_150 = arith.constant 1.000000e+00 : f32
    %340 = vector.broadcast %cst_150 : f32 to vector<5x64xf32>
    %341 = arith.addf %340, %339 : vector<5x64xf32>
    %342 = arith.divf %340, %341 : vector<5x64xf32>
    %343 = arith.mulf %335, %342 : vector<5x64xf32>
    %c1_151 = arith.constant 1 : index
    %c0_152 = arith.constant 0 : index
    %c0_153 = arith.constant 0 : index
    %344 = vector.load %arg16[%c1_151, %c0_152, %c0_153] : memref<2x64x32xf32, #tpu.memory_space<vmem>>, vector<1x64x32xf32>
    %345 = vector.shape_cast %344 : vector<1x64x32xf32> to vector<64x32xf32>
    %cst_154 = arith.constant dense<0.000000e+00> : vector<5x32xf32>
    %346 = tpu.matmul %343, %345, %cst_154 {dimension_numbers = #tpu.dot_dimension_numbers<[1], [0], [0], [1], [0, 0, 1, 1], [], []>} : vector<5x64xf32>, vector<64x32xf32>, vector<5x32xf32> -> vector<5x32xf32>
    %c1_155 = arith.constant 1 : index
    %c0_156 = arith.constant 0 : index
    %c0_157 = arith.constant 0 : index
    %347 = vector.load %arg17[%c1_155, %c0_156, %c0_157] : memref<2x1x32xf32, #tpu.memory_space<vmem>>, vector<1x1x32xf32>
    %348 = vector.shape_cast %347 : vector<1x1x32xf32> to vector<1x32xf32>
    %349 = vector.broadcast %348 : vector<1x32xf32> to vector<5x32xf32>
    %350 = arith.addf %346, %349 : vector<5x32xf32>
    %351 = arith.addf %304, %350 : vector<5x32xf32>
    %352 = vector.extract_strided_slice %351 {offsets = [0, 0], sizes = [1, 32], strides = [1, 1]} : vector<5x32xf32> to vector<1x32xf32>
    %c0_158 = arith.constant 0 : index
    %c0_159 = arith.constant 0 : index
    %353 = vector.load %arg18[%c0_158, %c0_159] : memref<1x32xf32, #tpu.memory_space<vmem>>, vector<1x32xf32>
    %c0_160 = arith.constant 0 : index
    %c0_161 = arith.constant 0 : index
    %354 = vector.load %arg19[%c0_160, %c0_161] : memref<1x32xf32, #tpu.memory_space<vmem>>, vector<1x32xf32>
    %cst_162 = arith.constant dense<0.000000e+00> : vector<1xf32>
    %355 = vector.multi_reduction <add>, %352, %cst_162 [1] : vector<1x32xf32> to vector<1xf32>
    %356 = vector.shape_cast %355 : vector<1xf32> to vector<1x1xf32>
    %cst_163 = arith.constant 3.200000e+01 : f32
    %357 = vector.broadcast %cst_163 : f32 to vector<1x1xf32>
    %358 = arith.divf %356, %357 : vector<1x1xf32>
    %359 = vector.broadcast %358 : vector<1x1xf32> to vector<1x32xf32>
    %360 = arith.subf %352, %359 : vector<1x32xf32>
    %361 = arith.mulf %360, %360 : vector<1x32xf32>
    %cst_164 = arith.constant dense<0.000000e+00> : vector<1xf32>
    %362 = vector.multi_reduction <add>, %361, %cst_164 [1] : vector<1x32xf32> to vector<1xf32>
    %363 = vector.shape_cast %362 : vector<1xf32> to vector<1x1xf32>
    %cst_165 = arith.constant 3.200000e+01 : f32
    %364 = vector.broadcast %cst_165 : f32 to vector<1x1xf32>
    %365 = arith.divf %363, %364 : vector<1x1xf32>
    %cst_166 = arith.constant 9.99999974E-6 : f32
    %366 = vector.broadcast %cst_166 : f32 to vector<1x1xf32>
    %367 = arith.addf %365, %366 : vector<1x1xf32>
    %368 = math.rsqrt %367 : vector<1x1xf32>
    %369 = vector.broadcast %368 : vector<1x1xf32> to vector<1x32xf32>
    %370 = arith.mulf %360, %369 : vector<1x32xf32>
    %371 = arith.mulf %370, %353 : vector<1x32xf32>
    %372 = arith.addf %371, %354 : vector<1x32xf32>
    %c0_167 = arith.constant 0 : index
    %c0_168 = arith.constant 0 : index
    %373 = vector.load %arg20[%c0_167, %c0_168] : memref<32x32xf32, #tpu.memory_space<vmem>>, vector<32x32xf32>
    %cst_169 = arith.constant dense<0.000000e+00> : vector<1x32xf32>
    %374 = tpu.matmul %372, %373, %cst_169 {dimension_numbers = #tpu.dot_dimension_numbers<[1], [0], [0], [1], [0, 0, 1, 1], [], []>} : vector<1x32xf32>, vector<32x32xf32>, vector<1x32xf32> -> vector<1x32xf32>
    %375 = arith.mulf %374, %374 : vector<1x32xf32>
    %cst_170 = arith.constant dense<0.000000e+00> : vector<1xf32>
    %376 = vector.multi_reduction <add>, %375, %cst_170 [1] : vector<1x32xf32> to vector<1xf32>
    %377 = vector.shape_cast %376 : vector<1xf32> to vector<1x1xf32>
    %378 = math.rsqrt %377 : vector<1x1xf32>
    %379 = vector.broadcast %378 : vector<1x1xf32> to vector<1x32xf32>
    %380 = arith.mulf %374, %379 : vector<1x32xf32>
    %c0_171 = arith.constant 0 : index
    %c0_172 = arith.constant 0 : index
    %c0_173 = arith.constant 0 : index
    %381 = vector.load %arg21[%c0_171, %c0_172, %c0_173] : memref<1x1x32xf32, #tpu.memory_space<vmem>>, vector<1x1x32xf32>
    %382 = vector.shape_cast %381 : vector<1x1x32xf32> to vector<1x32xf32>
    %383 = vector.shape_cast %380 : vector<1x32xf32> to vector<1x1x32xf32>
    tpu.vector_store %arg21[%c0_171, %c0_172, %c0_173], %383 {strides = array<i32>} : memref<1x1x32xf32, #tpu.memory_space<vmem>>, vector<1x1x32xf32>,
    return
  }
  func.func @transform_0(%arg0: i32) -> (i32, i32, i32) {
    %c0_i32 = arith.constant 0 : i32
    %c0_i32_0 = arith.constant 0 : i32
    %c0_i32_1 = arith.constant 0 : i32
    return %arg0, %c0_i32, %c0_i32_0 : i32, i32, i32
  }
  func.func @transform_1(%arg0: i32) -> (i32, i32) {
    %c0_i32 = arith.constant 0 : i32
    %c0_i32_0 = arith.constant 0 : i32
    %c0_i32_1 = arith.constant 0 : i32
    return %c0_i32, %c0_i32_0 : i32, i32
  }
  func.func @transform_2(%arg0: i32) -> (i32, i32) {
    %c0_i32 = arith.constant 0 : i32
    %c0_i32_0 = arith.constant 0 : i32
    %c0_i32_1 = arith.constant 0 : i32
    return %c0_i32, %c0_i32_0 : i32, i32
  }
  func.func @transform_3(%arg0: i32) -> (i32, i32) {
    %c0_i32 = arith.constant 0 : i32
    %c0_i32_0 = arith.constant 0 : i32
    %c0_i32_1 = arith.constant 0 : i32
    return %c0_i32, %c0_i32_0 : i32, i32
  }
  func.func @transform_4(%arg0: i32) -> (i32, i32) {
    %c0_i32 = arith.constant 0 : i32
    %c0_i32_0 = arith.constant 0 : i32
    %c0_i32_1 = arith.constant 0 : i32
    return %c0_i32, %c0_i32_0 : i32, i32
  }
  func.func @transform_5(%arg0: i32) -> (i32, i32, i32) {
    %c0_i32 = arith.constant 0 : i32
    %c0_i32_0 = arith.constant 0 : i32
    %c0_i32_1 = arith.constant 0 : i32
    %c0_i32_2 = arith.constant 0 : i32
    return %c0_i32, %c0_i32_0, %c0_i32_1 : i32, i32, i32
  }
  func.func @transform_6(%arg0: i32) -> (i32, i32, i32) {
    %c0_i32 = arith.constant 0 : i32
    %c0_i32_0 = arith.constant 0 : i32
    %c0_i32_1 = arith.constant 0 : i32
    %c0_i32_2 = arith.constant 0 : i32
    return %c0_i32, %c0_i32_0, %c0_i32_1 : i32, i32, i32
  }
  func.func @transform_7(%arg0: i32) -> (i32, i32, i32) {
    %c0_i32 = arith.constant 0 : i32
    %c0_i32_0 = arith.constant 0 : i32
    %c0_i32_1 = arith.constant 0 : i32
    %c0_i32_2 = arith.constant 0 : i32
    return %c0_i32, %c0_i32_0, %c0_i32_1 : i32, i32, i32
  }
  func.func @transform_8(%arg0: i32) -> (i32, i32, i32) {
    %c0_i32 = arith.constant 0 : i32
    %c0_i32_0 = arith.constant 0 : i32
    %c0_i32_1 = arith.constant 0 : i32
    %c0_i32_2 = arith.constant 0 : i32
    return %c0_i32, %c0_i32_0, %c0_i32_1 : i32, i32, i32
  }
  func.func @transform_9(%arg0: i32) -> (i32, i32, i32) {
    %c0_i32 = arith.constant 0 : i32
    %c0_i32_0 = arith.constant 0 : i32
    %c0_i32_1 = arith.constant 0 : i32
    %c0_i32_2 = arith.constant 0 : i32
    return %c0_i32, %c0_i32_0, %c0_i32_1 : i32, i32, i32
  }
  func.func @transform_10(%arg0: i32) -> (i32, i32, i32) {
    %c0_i32 = arith.constant 0 : i32
    %c0_i32_0 = arith.constant 0 : i32
    %c0_i32_1 = arith.constant 0 : i32
    %c0_i32_2 = arith.constant 0 : i32
    return %c0_i32, %c0_i32_0, %c0_i32_1 : i32, i32, i32
  }
  func.func @transform_11(%arg0: i32) -> (i32, i32, i32) {
    %c0_i32 = arith.constant 0 : i32
    %c0_i32_0 = arith.constant 0 : i32
    %c0_i32_1 = arith.constant 0 : i32
    %c0_i32_2 = arith.constant 0 : i32
    return %c0_i32, %c0_i32_0, %c0_i32_1 : i32, i32, i32
  }
  func.func @transform_12(%arg0: i32) -> (i32, i32, i32) {
    %c0_i32 = arith.constant 0 : i32
    %c0_i32_0 = arith.constant 0 : i32
    %c0_i32_1 = arith.constant 0 : i32
    %c0_i32_2 = arith.constant 0 : i32
    return %c0_i32, %c0_i32_0, %c0_i32_1 : i32, i32, i32
  }
  func.func @transform_13(%arg0: i32) -> (i32, i32, i32) {
    %c0_i32 = arith.constant 0 : i32
    %c0_i32_0 = arith.constant 0 : i32
    %c0_i32_1 = arith.constant 0 : i32
    %c0_i32_2 = arith.constant 0 : i32
    return %c0_i32, %c0_i32_0, %c0_i32_1 : i32, i32, i32
  }
  func.func @transform_14(%arg0: i32) -> (i32, i32, i32) {
    %c0_i32 = arith.constant 0 : i32
    %c0_i32_0 = arith.constant 0 : i32
    %c0_i32_1 = arith.constant 0 : i32
    %c0_i32_2 = arith.constant 0 : i32
    return %c0_i32, %c0_i32_0, %c0_i32_1 : i32, i32, i32
  }
  func.func @transform_15(%arg0: i32) -> (i32, i32, i32) {
    %c0_i32 = arith.constant 0 : i32
    %c0_i32_0 = arith.constant 0 : i32
    %c0_i32_1 = arith.constant 0 : i32
    %c0_i32_2 = arith.constant 0 : i32
    return %c0_i32, %c0_i32_0, %c0_i32_1 : i32, i32, i32
  }
  func.func @transform_16(%arg0: i32) -> (i32, i32, i32) {
    %c0_i32 = arith.constant 0 : i32
    %c0_i32_0 = arith.constant 0 : i32
    %c0_i32_1 = arith.constant 0 : i32
    %c0_i32_2 = arith.constant 0 : i32
    return %c0_i32, %c0_i32_0, %c0_i32_1 : i32, i32, i32
  }
  func.func @transform_17(%arg0: i32) -> (i32, i32) {
    %c0_i32 = arith.constant 0 : i32
    %c0_i32_0 = arith.constant 0 : i32
    %c0_i32_1 = arith.constant 0 : i32
    return %c0_i32, %c0_i32_0 : i32, i32
  }
  func.func @transform_18(%arg0: i32) -> (i32, i32) {
    %c0_i32 = arith.constant 0 : i32
    %c0_i32_0 = arith.constant 0 : i32
    %c0_i32_1 = arith.constant 0 : i32
    return %c0_i32, %c0_i32_0 : i32, i32
  }
  func.func @transform_19(%arg0: i32) -> (i32, i32) {
    %c0_i32 = arith.constant 0 : i32
    %c0_i32_0 = arith.constant 0 : i32
    %c0_i32_1 = arith.constant 0 : i32
    return %c0_i32, %c0_i32_0 : i32, i32
  }
  func.func @transform_20(%arg0: i32) -> (i32, i32, i32) {
    %c0_i32 = arith.constant 0 : i32
    %c0_i32_0 = arith.constant 0 : i32
    %c0_i32_1 = arith.constant 0 : i32
    return %arg0, %c0_i32, %c0_i32_0 : i32, i32, i32
  }
}

</mosaic_0001>

<bundles_post_ra>
// kernel: _lambda_.1
= control target key start
LH: loop header
LB: loop body
LE: loop exit
PB: predicated region body
PF: predicated region fallthrough
CT: control target
= control target key end

     0   :  { %s4958_s0 = inlined_call_operand.vmem [shape: f32[2,5,192], index: 0, kind: input, shape index: {}]   ;;  %s4959_s1 = inlined_call_operand.vmem [shape: f32[192,32], index: 1, kind: input, shape index: {}]   ;;  %s4960_s2 = inlined_call_operand.vmem [shape: f32[5,32], index: 2, kind: input, shape index: {}]   ;;  %s4961_s3 = inlined_call_operand.vmem [shape: f32[1,32], index: 3, kind: input, shape index: {}, may-alias: {3,17}]   ;;  %s4962_s4 = inlined_call_operand.vmem [shape: f32[1,32], index: 4, kind: input, shape index: {}, may-alias: {4,18}]   ;;  %s4963_s5 = inlined_call_operand.vmem [shape: f32[2,1,32], index: 5, kind: input, shape index: {}, may-alias: {5,11}]   ;;  %s4964_s6 = inlined_call_operand.vmem [shape: f32[2,1,32], index: 6, kind: input, shape index: {}, may-alias: {6,10,12,16}]   ;;  %s4965_s7 = inlined_call_operand.vmem [shape: f32[2,32,96], index: 7, kind: input, shape index: {}]   ;;  %s4966_s8 = inlined_call_operand.vmem [shape: f32[2,1,96], index: 8, kind: input, shape index: {}]   ;;  %s4967_s9 = inlined_call_operand.vmem [shape: f32[2,32,32], index: 9, kind: input, shape index: {}]   ;;  %s4968_s10 = inlined_call_operand.vmem [shape: f32[2,1,32], index: 10, kind: input, shape index: {}, may-alias: {6,10,12,16}]   ;;  %s4969_s11 = inlined_call_operand.vmem [shape: f32[2,1,32], index: 11, kind: input, shape index: {}, may-alias: {5,11}]   ;;  %s4970_s12 = inlined_call_operand.vmem [shape: f32[2,1,32], index: 12, kind: input, shape index: {}, may-alias: {6,10,12,16}]   ;;  %s4971_s13 = inlined_call_operand.vmem [shape: f32[2,32,64], index: 13, kind: input, shape index: {}]   ;;  %s4972_s14 = inlined_call_operand.vmem [shape: f32[2,1,64], index: 14, kind: input, shape index: {}]   ;;  %s4973_s15 = inlined_call_operand.vmem [shape: f32[2,64,32], index: 15, kind: input, shape index: {}]   ;;  %s4974_s16 = inlined_call_operand.vmem [shape: f32[2,1,32], index: 16, kind: input, shape index: {}, may-alias: {6,10,12,16}]   ;;  %s4975_s17 = inlined_call_operand.vmem [shape: f32[1,32], index: 17, kind: input, shape index: {}, may-alias: {3,17}]   ;;  %s4976_s18 = inlined_call_operand.vmem [shape: f32[1,32], index: 18, kind: input, shape index: {}, may-alias: {4,18}]   ;;  %s4977_s19 = inlined_call_operand.vmem [shape: f32[32,32], index: 19, kind: input, shape index: {}]   ;;  %s4978_s20 = inlined_call_operand.hbm [shape: f32[2,1,32], index: 20, kind: output, shape index: {}]  }
   0x1   :  { %4994 = sst [smem:[#allocation11_spill]] %s4958_s0 }
   0x2   :  { %4995 = sst [smem:[#allocation12_spill]] %s4959_s1 }
   0x3   :  { %4996 = sst [smem:[#allocation13_spill]] %s4960_s2 }
   0x4   :  { %4997 = sst [smem:[#allocation14_spill]] %s4961_s3 }
   0x5   :  { %4998 = sst [smem:[#allocation15_spill]] %s4962_s4 }
   0x6   :  { %4999 = sst [smem:[#allocation16_spill]] %s4978_s20 }
   0x7   :  { %25 = vsyncpa [#allocation3], 0 }
   0x8   :  { %27 = vsyncpa [#allocation3 + $0x1], 0  ;;  %s4323_s1 = smov 0   ;;  %s4325_s22 = smov 0  }
   0x9   :  { %s4327_s23 = smov 0   ;;  %s4329_s24 = smov 0  }
   0xa LB: > { %5000 = sst [smem:[#allocation5_spill]] %s4189_s1  ;;  %s4344_s2 = sadd.s32 4294967295, %s4201_s24   ;;  %s4201_s24 = sphi %s4329_s24, %s5024_s24   ;;  %s4197_s23 = sphi %s4327_s23, %s5026_s23   ;;  %s4193_s22 = sphi %s4325_s22, %s5028_s22   ;;  %s4189_s1 = sphi %s4323_s1, %s5027_s1  }
   0xb   : > { %5001 = sst [smem:[#allocation6_spill]] %s4197_s23  ;;  %s3532_s25 = sadd.s32 4294967294, %s4201_s24  }
   0xc   : > { %5002 = sst [smem:[#allocation7_spill]] %s4201_s24  ;;  %s4348_s3 = sadd.s32 1, %s4201_s24  }
   0xd   : > { %5003 = sst [smem:[#allocation8_spill]] %s4348_s3  ;;  %s465_s26 = sadd.s32 1, %s4197_s23 }
   0xe   : > { %s462_s27 = ssub.s32 %s4201_s24, %s4348_s3  ;;  %p475_p0 = scmp.ne.s32.totalorder %s4197_s23, %s4193_s22 }
   0xf   : > { %p463_p1 = scmp.eq.s32.totalorder %s462_s27, 0  ;;  %p476_p2 = scmp.eq.s32.totalorder %s4344_s2, 1 }
  0x10   : > { %p481_p3 = scmp.ne.s32.totalorder %s4193_s22, %s4189_s1  ;;  %p482_p4 = scmp.eq.s32.totalorder %s3532_s25, 1 }
  0x11   : > { %s4359_s28 = scalar_select %p463_p1, %s4197_s23, %s465_s26  }
  0x12   : > { %p4361_p5 = por %p476_p2, %p475_p0  ;;  %p4365_p6 = por %p482_p4, %p481_p3 }
  0x13   : > { %5004 = sst [smem:[#allocation9_spill]] %s4359_s28  ;;  %p3535_p7 = scmp.ge.s32.totalorder %s4201_s24, 1 }
  0x14   : > { %s5006_s29 = scalar_select %p4365_p6, 1, 0 }
  0x15   : > { %p565_p8 = scmp.lt.s32.totalorder %s4201_s24, 3 }
  0x16   : > { %5007 = sst [smem:[#allocation10_spill]] %s5006_s29 }
  0x17   : > { %p566_p9 = pnand %p3535_p7, %p565_p8 }
  0x18   : > { %s5008_s21 = sld [smem:[#allocation12_spill]] (!%p566_p9)  ;;  %p622_p10 = scmp.lt.s32.totalorder (!%p566_p9), %s4344_s2, 1  ;;  %v4203_v3 = vmov (!%p566_p9), 0.0|0.0   ;;  %vm654_vm0 = vcmask (!%p566_p9), 523264   ;;  %vm730_vm1 = vcmask (!%p566_p9), 258048   ;;  %vm4204_vm2 = vmmov (!%p566_p9), 0  }
  0x19   : > { %569 = sbr.rel (%p566_p9) target bundleno = 9349 (0x2485), region = 100  ;;  %3942 = vmatprep.subr.bf16.mxu0 (!%p566_p9), %v4203_v3  ;;  %3978 = vmatprep.subr.bf16.mxu1 (!%p566_p9), %v4203_v3  ;;  %s5009_s23 = sld [smem:[#allocation11_spill]] (!%p566_p9)  ;;  %vm799_vm3 = vcmask (!%p566_p9), 261120   ;;  %vm880_vm4 = vcmask (!%p566_p9), 64512   ;;  %vm955_vm5 = vcmask (!%p566_p9), 36864   ;;  %vm973_vm6 = vcmask (!%p566_p9), 1044480  }
  0x1a   : > { %s5010_s29 = sld [smem:[#allocation13_spill]] (!%p566_p9)  ;;  %s5011_s28 = sld [smem:[#allocation14_spill]] (!%p566_p9)  ;;  %vm969_vm7 = vcmask (!%p566_p9), 39936   ;;  %vm3364_vm8 = vcmask (!%p566_p9), 253952  }
  0x1b   : > { %s5012_s26 = sld [smem:[#allocation15_spill]] (!%p566_p9)  ;;  %s4206_s0 = smov (!%p566_p9), 96  }
  0x1c   : > { %s4207_s25 = smov (!%p566_p9), 88   ;;  %s4992_s1 = smov (!%p566_p9), 64  }
  0x1d   : > { %s4989_s20 = smov (!%p566_p9), 104   ;;  %s4990_s24 = smov (!%p566_p9), 48  }
  0x1e   : > { %v629_v0 = vld [vmem:[%s5008_s21] sm:$0xff] (!%p566_p9)  ;;  %v630_v1 = vld [vmem:[%s5008_s21 + $0x8] sm:$0xff] (!%p566_p9)  ;;  %v631_v2 = vld [vmem:[%s5008_s21 + $0x10] sm:$0xff] (!%p566_p9) }
  0x1f   : > { %v3943_v4 = vpack.c.bf16 (!%p566_p9), %v630_v1, %v629_v0  ;;  %v632_v5 = vld [vmem:[%s5008_s21 + $0x18] sm:$0xff] (!%p566_p9)  ;;  %v633_v7 = vld [vmem:[%s5008_s21 + $0x20] sm:$0xff] (!%p566_p9)  ;;  %v634_v8 = vld [vmem:[%s5008_s21 + $0x28] sm:$0xff] (!%p566_p9) }
  0x20   : > { %s623_s30 = scalar_select %p622_p10, %s4344_s2, 1  ;;  %v3946_v6 = vpack.c.bf16 %v632_v5, %v631_v2  ;;  %v3949_v9 = vpack.c.bf16 %v634_v8, %v633_v7  ;;  %v635_v10 = vld [vmem:[%s5008_s21 + $0x30] sm:$0xff]  ;;  %v636_v11 = vld [vmem:[%s5008_s21 + $0x38] sm:$0xff]  ;;  %v637_v14 = vld [vmem:[%s5008_s21 + $0x40] sm:$0xff] }
  0x21   : > { %3944 = vmatpush1.bf16.msra.mxu0 %v3943_v4  ;;  %v3952_v13 = vpack.c.bf16 %v636_v11, %v635_v10  ;;  %v638_v15 = vld [vmem:[%s5008_s21 + $0x48] sm:$0xff]  ;;  %v639_v17 = vld [vmem:[%s5008_s21 + $0x50] sm:$0xff]  ;;  %v640_v18 = vld [vmem:[%s5008_s21 + $0x58] sm:$0xff] }
  0x22   : > { %3945 = vmatprep.subr.bf16.mxu0 %v4203_v3  ;;  %s3637_s27 = sshll.u32 %s623_s30, 4  ;;  %v3955_v16 = vpack.c.bf16 %v638_v15, %v637_v14  ;;  %v3958_v19 = vpack.c.bf16 %v640_v18, %v639_v17  ;;  %v641_v20 = vld [vmem:[%s5008_s21 + $0x60] sm:$0xff]  ;;  %v642_v21 = vld [vmem:[%s5008_s21 + $0x68] sm:$0xff]  ;;  %v643_v23 = vld [vmem:[%s5008_s21 + $0x70] sm:$0xff]  ;;  %s4993_s30 = smov 112  }
  0x23   : > { %s4397_s3 = scalar_lea.vmem %s5009_s23, %s3637_s27  ;;  %v3961_v22 = vpack.c.bf16 %v642_v21, %v641_v20  ;;  %v644_v24 = vld [vmem:[%s5008_s21 + $0x78] sm:$0xff]  ;;  %v645_v26 = vld [vmem:[%s5008_s21 + $0x80] sm:$0xff]  ;;  %v646_v27 = vld [vmem:[%s5008_s21 + $0x88] sm:$0xff]  ;;  %s4987_s23 = smov 72  }
  0x24   : > { %v628_v12 = vld [vmem:[%s4397_s3 + $0x8] sm:$0x1f]  ;;  %v3964_v25 = vpack.c.bf16 %v644_v24, %v643_v23  ;;  %v3967_v28 = vpack.c.bf16 %v646_v27, %v645_v26  ;;  %v647_v29 = vld [vmem:[%s5008_s21 + $0x90] sm:$0xff]  ;;  %v648_v30 = vld [vmem:[%s5008_s21 + $0x98] sm:$0xff] }
  0x25   : > { %3947 = vmatpush1.bf16.msra.mxu0 %v3946_v6  ;;  %3538 = vmatprep.mubr.msk.f32.mxu0 %vm654_vm0, %v628_v12  ;;  %v3970_v31 = vpack.c.bf16 %v648_v30, %v647_v29  ;;  %v649_v32 = vld [vmem:[%s5008_s21 + $0xa0] sm:$0xff]  ;;  %v650_v33 = vld [vmem:[%s5008_s21 + $0xa8] sm:$0xff]  ;;  %v651_v35 = vld [vmem:[%s5008_s21 + $0xb0] sm:$0xff]  ;;  %v4205_v6 = vmov 0.0  }
  0x26   : > { %3948 = vmatprep.subr.bf16.mxu0 %v4203_v3  ;;  %v3973_v34 = vpack.c.bf16 %v650_v33, %v649_v32  ;;  %v652_v36 = vld [vmem:[%s5008_s21 + $0xb8] sm:$0xff]  ;;  %v627_v38 = vld [vmem:[%s4397_s3] sm:$0x1f]  ;;  %v789_v1 = vld [vmem:[%s4965_s7 + $0x8] sm:$0xff]  ;;  %3737 = vmatprep.mubr.msk.f32.mxu1 %vm4204_vm2, %v4205_v6  ;;  %s4210_s3 = smov 56  }
  0x27   : > { %v3976_v37 = vpack.c.bf16 %v652_v36, %v651_v35  ;;  %v653_v39 = vld [vmem:[%s5010_s29] sm:$0x1f]  ;;  %v790_v2 = vld [vmem:[%s4965_s7 + $0x10] sm:$0xff]  ;;  %v791_v5 = vld [vmem:[%s4965_s7 + $0x18] sm:$0xff]  ;;  %s4209_s29 = smov 120  }
  0x28   : > { %v3539_v53 = vld [vmem:[%s5011_s28] ss:$0 sm:$0xff]  ;;  %v3982_v7 = vpack.c.bf16 %v791_v5, %v790_v2  ;;  %s4991_s28 = smov 80  }
  0x29   : > { %3950 = vmatpush1.bf16.msra.mxu0 %v3949_v9  ;;  %v3540_v55 = vld [vmem:[%s5012_s26] ss:$0 sm:$0xff]  ;;  %s4988_s26 = smov 40  }
  0x2a   : > { %3951 = vmatprep.subr.bf16.mxu0 %v4203_v3  ;;  %v788_v0 = vld [vmem:[%s4965_s7] sm:$0xff] }
  0x2b   : > { %v3979_v4 = vpack.c.bf16 %v789_v1, %v788_v0  ;;  %v3541_v12 = vld [vmem:[%s4963_s5] ss:$0 sm:$0xff] }
  0x2c   : > { %v3542_v14 = vld [vmem:[%s4964_s6] ss:$0 sm:$0xff] }
  0x2d   : > { %3953 = vmatpush1.bf16.msra.mxu0 %v3952_v13  ;;  %3980 = vmatpush3.bf16.msra.mxu1 %v3979_v4  ;;  %v3543_v17 = vld [vmem:[%s4966_s8] ss:$0 sm:$0xff] }
  0x2e   : > { %3954 = vmatprep.subr.bf16.mxu0 %v4203_v3  ;;  %3981 = vmatprep.subr.bf16.mxu1 %v4203_v3 }
  0x31   : > { %3956 = vmatpush1.bf16.msra.mxu0 %v3955_v16  ;;  %3983 = vmatpush3.bf16.msra.mxu1 %v3982_v7 }
  0x32   : > { %3957 = vmatprep.subr.bf16.mxu0 %v4203_v3  ;;  %3740 = vmatprep.subr.mxu1 %v4205_v6 }
  0x35   : > { %3959 = vmatpush1.bf16.msra.mxu0 %v3958_v19 }
  0x36   : > { %3960 = vmatprep.subr.bf16.mxu0 %v4203_v3 }
  0x39   : > { %3962 = vmatpush1.bf16.msra.mxu0 %v3961_v22 }
  0x3a   : > { %3963 = vmatprep.subr.bf16.mxu0 %v4203_v3 }
  0x3d   : > { %3965 = vmatpush1.bf16.msra.mxu0 %v3964_v25 }
  0x3e   : > { %3966 = vmatprep.subr.bf16.mxu0 %v4203_v3 }
  0x41   : > { %3968 = vmatpush1.bf16.msra.mxu0 %v3967_v28 }
  0x42   : > { %3969 = vmatprep.subr.bf16.mxu0 %v4203_v3 }
  0x45   : > { %3971 = vmatpush1.bf16.msra.mxu0 %v3970_v31 }
  0x46   : > { %3972 = vmatprep.subr.bf16.mxu0 %v4203_v3 }
  0x49   : > { %3974 = vmatpush1.bf16.msra.mxu0 %v3973_v34 }
  0x4a   : > { %3975 = vmatprep.subr.bf16.mxu0 %v4203_v3 }
  0x4d   : > { %3977 = vmatpush1.bf16.msra.mxu0 %v3976_v37 }
  0x4e   : > { %3790 = vmatprep.subr.mxu0 %v4205_v6 }
  0x50   : > { %723 = vmatmul.mubr.f32.vlgmr.msra.gmra.mrb[0].mxu0 %v627_v38 }
  0x51   : > { %3792 = vmatprep.mubr.msk.f32.mxu0 %vm4204_vm2, %v4205_v6 }
 0x123   : > { %v724_v40 = vpop.f32.mrb[0].mxu0 }
 0x124   : > { %v725_v41 = vadd.f32 %v724_v40, %v653_v39  ;;  %v726_v42 = vpop.f32.mrb[1].mxu0 }
 0x126   : > { %v731_v43 = vsel %vm730_vm1, %v725_v41, 0.0 }
 0x127   : > { %732 = vadd.xlane.f32.xlu0 %v731_v43 }
 0x1b4   : > { %v733_v44 = vpop.xlane.xlu0 %732 }
 0x1b5   : > { %v735_v45 = vmul.f32 0.03125, %v733_v44 }
 0x1b7   : > { %v736_v46 = vsub.f32 %v725_v41, %v735_v45 }
 0x1b9   : > { %v737_v47 = vmul.f32 %v736_v46, %v736_v46 }
 0x1bb   : > { %v738_v48 = vsel %vm730_vm1, %v737_v47, 0.0 }
 0x1bc   : > { %739 = vadd.xlane.f32.xlu0 %v738_v48 }
 0x249   : > { %v740_v49 = vpop.xlane.xlu0 %739 }
 0x24a   : > { %v741_v50 = vmul.f32 0.03125, %v740_v49 }
 0x24c   : > { %v742_v51 = vadd.f32 1e-05, %v741_v50  ;;  %v874_v50 = vld [vmem:[%s4967_s9 + $0x8] sm:$0xff] }
 0x24e   : > { %4085 = vrsqrt.f32 %v742_v51  ;;  %v873_v51 = vld [vmem:[%s4967_s9] sm:$0xff] }
 0x258   : > { %v4086_v52 = vpop.eup %4085 }
 0x259   : > { %v744_v54 = vmul.f32 %v4086_v52, %v736_v46 }
 0x25b   : > { %v751_v56 = vmul.f32 %v3539_v53, %v744_v54 }
 0x25d   : > { %v4477_v57 = vadd.f32 %v3540_v55, %v751_v56 }
 0x25f   : > { %v761_v58 = vsel %vm730_vm1, %v4477_v57, 0.0 }
 0x260   : > { %762 = vadd.xlane.f32.xlu1 %v761_v58 }
 0x2ed   : > { %v763_v59 = vpop.xlane.xlu1 %762 }
 0x2ee   : > { %v764_v60 = vmul.f32 0.03125, %v763_v59 }
 0x2f0   : > { %v765_v61 = vsub.f32 %v4477_v57, %v764_v60 }
 0x2f2   : > { %v766_v62 = vmul.f32 %v765_v61, %v765_v61 }
 0x2f4   : > { %v767_v63 = vsel %vm730_vm1, %v766_v62, 0.0 }
 0x2f5   : > { %768 = vadd.xlane.f32.xlu1 %v767_v63 }
 0x382   : > { %v769_v8 = vpop.xlane.xlu1 %768 }
 0x383   : > { %v770_v9 = vmul.f32 0.03125, %v769_v8 }
 0x385   : > { %v771_v10 = vadd.f32 1e-05, %v770_v9 }
 0x387   : > { %4087 = vrsqrt.f32 %v771_v10 }
 0x391   : > { %v4088_v11 = vpop.eup %4087 }
 0x392   : > { %v773_v13 = vmul.f32 %v4088_v11, %v765_v61 }
 0x394   : > { %v780_v15 = vmul.f32 %v3541_v12, %v773_v13  ;;  %v875_v12 = vld [vmem:[%s4967_s9 + $0x10] sm:$0xff] }
 0x396   : > { %v787_v16 = vadd.f32 %v3542_v14, %v780_v15 }
 0x398   : > { %3738 = vmatmul.mubr.msk.f32.vlgmr.msra.gmra.mrb[0].mxu1 %vm799_vm3, %v787_v16 }
 0x399   : > { %3742 = vmatprep.mubr.msk.f32.mxu1 %vm4204_vm2, %v4205_v6 }
 0x46b   : > { %v869_v18 = vpop.f32.mrb[0].mxu1 }
 0x46c   : > { %v4514_v19 = vadd.f32 %v3543_v17, %v869_v18  ;;  %v3739_v20 = vpop.f32.mrb[1].mxu1 }
 0x46e   : > { %878 = vrot.lane.b32.xlu0 %v4514_v19, %s4206_s0 }
 0x472   : > { %1048 = vrot.lane.b32.xlu0 %v4514_v19, %s4207_s25 }
 0x4e0   : > { %v879_v21 = vpop.permute.xlu0 %878 }
 0x4e1   : > { %3741 = vmatpush3.xpose.msk.msra.mxu1 %vm880_vm4, %v879_v21 }
 0x4e2   : > { %3745 = vmatprep.subr.mxu1 %v4205_v6 }
 0x4e4   : > { %3743 = vmatmul.mubr.msk.f32.vlgmr.msra.gmra.mrb[2].mxu1 %vm880_vm4, %v4514_v19  ;;  %v1049_v34 = vpop.permute.xlu0 %1048 }
 0x4e5   : > { %3747 = vmatprep.mubr.msk.f32.mxu1 %vm4204_vm2, %v4205_v6 }
 0x5b7   : > { %v951_v22 = vpop.f32.mrb[2].mxu1 }
 0x5b8   : > { %v3744_v23 = vpop.f32.mrb[3].mxu1  ;;  %v956_v24 = vsel %vm955_vm5, %v951_v22, -inf }
 0x5b9   : > { %957 = vmax.xlane.f32.xlu1 %v956_v24 }
 0x5ca   : > { %967 = vrot.lane.b32.xlu1 %v4514_v19, %s4992_s1 }
 0x646   : > { %v958_v25 = vpop.xlane.xlu1 %957 }
 0x647   : > { %v959_v26 = vsub.f32 %v951_v22, %v958_v25 }
 0x649   : > { %v960_v27 = vmul.f32 1.442695, %v959_v26 }
 0x64a   : > { %v968_v28 = vpop.permute.xlu1 %967 }
 0x64b   : > { %4089 = vpow2.f32 %v960_v27  ;;  %3746 = vmatpush3.msk.msra.mxu1 %vm973_vm6, %v968_v28 }
 0x64c   : > { %3750 = vmatprep.subr.mxu1 %v4205_v6 }
 0x655   : > { %v4090_v29 = vpop.eup %4089 }
 0x656   : > { %v962_v30 = vsel %vm955_vm5, %v4090_v29, 0.0 }
 0x657   : > { %963 = vadd.xlane.f32.xlu1 %v962_v30  ;;  %v876_v30 = vld [vmem:[%s4967_s9 + $0x18] sm:$0xff] }
 0x668   : > { %1046 = vrot.lane.b32.xlu1 %v4514_v19, %s4209_s29 }
 0x6e4   : > { %v964_v31 = vpop.xlane.xlu1 %963 }
 0x6e5   : > { %4091 = vrcp.f32 %v964_v31 }
 0x6e8   : > { %v1047_v35 = vpop.permute.xlu1 %1046 }
 0x6ef   : > { %v4092_v32 = vpop.eup %4091 }
 0x6f0   : > { %v966_v33 = vmul.f32 %v4092_v32, %v4090_v29 }
 0x6f2   : > { %3748 = vmatmul.mubr.msk.f32.vlgmr.msra.gmra.mrb[4].mxu1 %vm969_vm7, %v966_v33 }
 0x6f3   : > { %3751 = vmatpush3.xpose.msk.msra.mxu1 %vm880_vm4, %v1049_v34  ;;  %3752 = vmatprep.mubr.msk.f32.mxu1 %vm4204_vm2, %v4205_v6 }
 0x6f4   : > { %3755 = vmatprep.subr.mxu1 %v4205_v6 }
 0x6f6   : > { %3753 = vmatmul.mubr.msk.f32.vlgmr.msra.gmra.mrb[6].mxu1 %vm880_vm4, %v1047_v35 }
 0x6f7   : > { %3757 = vmatprep.mubr.msk.f32.mxu1 %vm4204_vm2, %v4205_v6 }
 0x7c5   : > { %v1042_v36 = vpop.f32.mrb[4].mxu1 }
 0x7c6   : > { %v3749_v37 = vpop.f32.mrb[5].mxu1 }
 0x7c9   : > { %v1120_v38 = vpop.f32.mrb[6].mxu1 }
 0x7ca   : > { %v3754_v39 = vpop.f32.mrb[7].mxu1  ;;  %v1124_v40 = vsel %vm955_vm5, %v1120_v38, -inf }
 0x7cb   : > { %1125 = vmax.xlane.f32.xlu0 %v1124_v40 }
 0x7e1   : > { %1135 = vrot.lane.b32.xlu0 %v4514_v19, %s4210_s3 }
 0x7e5   : > { %1358 = vrot.lane.b32.xlu0 %v4514_v19, %s4993_s30 }
 0x858   : > { %v1126_v41 = vpop.xlane.xlu0 %1125 }
 0x859   : > { %v1127_v42 = vsub.f32 %v1120_v38, %v1126_v41  ;;  %v3565_v38 = vld [vmem:[%s4968_s10] ss:$0 sm:$0xff] }
 0x85b   : > { %v1128_v43 = vmul.f32 1.442695, %v1127_v42 }
 0x85c   : > { %v1136_v44 = vpop.permute.xlu0 %1135 }
 0x85d   : > { %4093 = vpow2.f32 %v1128_v43  ;;  %3756 = vmatpush3.msk.msra.mxu1 %vm973_vm6, %v1136_v44 }
 0x85e   : > { %3760 = vmatprep.subr.mxu1 %v4205_v6 }
 0x860   : > { %v1359_v55 = vpop.permute.xlu0 %1358 }
 0x867   : > { %v4094_v45 = vpop.eup %4093 }
 0x868   : > { %v1130_v46 = vsel %vm955_vm5, %v4094_v45, 0.0 }
 0x869   : > { %1131 = vadd.xlane.f32.xlu1 %v1130_v46 }
 0x87a   : > { %1360 = vrot.lane.b32.xlu1 %v4514_v19, %s4991_s28  ;;  %s5017_s28 = smov 104  }
 0x8f6   : > { %v1132_v47 = vpop.xlane.xlu1 %1131 }
 0x8f7   : > { %4095 = vrcp.f32 %v1132_v47  ;;  %v1876_v47 = vld [vmem:[%s4971_s13] sm:$0xff] }
 0x8fa   : > { %v1361_v54 = vpop.permute.xlu1 %1360 }
 0x901   : > { %v4096_v48 = vpop.eup %4095 }
 0x902   : > { %v1134_v49 = vmul.f32 %v4096_v48, %v4094_v45 }
 0x904   : > { %3758 = vmatmul.mubr.msk.f32.vlgmr.msra.gmra.mrb[8].mxu1 %vm969_vm7, %v1134_v49  ;;  %v1878_v49 = vld [vmem:[%s4971_s13 + $0x10] sm:$0xff] }
 0x905   : > { %3761 = vmatpush3.msra.mxu1 %v874_v50  ;;  %3762 = vmatprep.mubr.msk.f32.mxu1 %vm4204_vm2, %v4205_v6  ;;  %v1879_v50 = vld [vmem:[%s4971_s13 + $0x18] sm:$0xff] }
 0x906   : > { %3765 = vmatprep.subr.mxu1 %v4205_v6 }
 0x9d7   : > { %v1208_v52 = vpop.f32.mrb[8].mxu1 }
 0x9d8   : > { %v3759_v53 = vpop.f32.mrb[9].mxu1  ;;  %3763 = vmatmul.mubr.msk.f32.vlgmr.msra.gmra.mrb[10].mxu1 %vm880_vm4, %v1208_v52 }
 0x9d9   : > { %3766 = vmatpush3.msra.mxu1 %v873_v51  ;;  %3767 = vmatprep.mubr.msk.f32.mxu1 %vm4204_vm2, %v4205_v6  ;;  %v3988_v51 = vpack.c.bf16 %v1879_v50, %v1878_v49 }
 0x9da   : > { %3770 = vmatprep.subr.mxu1 %v4205_v6 }
 0x9dc   : > { %3768 = vmatmul.mubr.msk.f32.vlgmr.msra.gmra.mrb[12].mxu1 %vm880_vm4, %v1042_v36 }
 0x9dd   : > { %3772 = vmatprep.mubr.msk.f32.mxu1 %vm4204_vm2, %v4205_v6 }
 0x9e0   : > { %3771 = vmatpush3.xpose.msk.msra.mxu1 %vm880_vm4, %v1361_v54 }
 0x9e1   : > { %3775 = vmatprep.subr.mxu1 %v4205_v6 }
 0x9e3   : > { %3773 = vmatmul.mubr.msk.f32.vlgmr.msra.gmra.mrb[14].mxu1 %vm880_vm4, %v1359_v55 }
 0x9e4   : > { %3777 = vmatprep.mubr.msk.f32.mxu1 %vm4204_vm2, %v4205_v6 }
 0xaab   : > { %v1281_v56 = vpop.f32.mrb[10].mxu1 }
 0xaac   : > { %v3764_v58 = vpop.f32.mrb[11].mxu1 }
 0xaaf   : > { %v1354_v59 = vpop.f32.mrb[12].mxu1 }
 0xab0   : > { %v1355_v60 = vadd.f32 %v1354_v59, %v1281_v56  ;;  %v3769_v61 = vpop.f32.mrb[13].mxu1  ;;  %v3566_v56 = vld [vmem:[%s4969_s11] ss:$0 sm:$0xff] }
 0xab1   : > { %v3567_v59 = vld [vmem:[%s4970_s12] ss:$0 sm:$0xff] }
 0xab6   : > { %v1432_v62 = vpop.f32.mrb[14].mxu1 }
 0xab7   : > { %v3774_v63 = vpop.f32.mrb[15].mxu1  ;;  %v1436_v0 = vsel %vm955_vm5, %v1432_v62, -inf }
 0xab8   : > { %1437 = vmax.xlane.f32.xlu1 %v1436_v0  ;;  %v1969_v63 = vld [vmem:[%s4973_s15 + $0x8] sm:$0xff] }
 0xac9   : > { %1600 = vrot.lane.b32.xlu1 %v4514_v19, %s4987_s23 }
 0xacd   : > { %1598 = vrot.lane.b32.xlu1 %v4514_v19, %s4989_s20 }
 0xb45   : > { %v1438_v1 = vpop.xlane.xlu1 %1437 }
 0xb46   : > { %v1439_v2 = vsub.f32 %v1432_v62, %v1438_v1  ;;  %v1968_v62 = vld [vmem:[%s4973_s15] sm:$0xff]  ;;  %v1970_v1 = vld [vmem:[%s4973_s15 + $0x10] sm:$0xff] }
 0xb47   : > { %v3991_v0 = vpack.c.bf16 %v1969_v63, %v1968_v62 }
 0xb48   : > { %v1440_v4 = vmul.f32 1.442695, %v1439_v2  ;;  %v1971_v2 = vld [vmem:[%s4973_s15 + $0x18] sm:$0xff] }
 0xb49   : > { %v1601_v13 = vpop.permute.xlu1 %1600 }
 0xb4a   : > { %4097 = vpow2.f32 %v1440_v4  ;;  %v3994_v4 = vpack.c.bf16 %v1971_v2, %v1970_v1 }
 0xb4d   : > { %v1599_v16 = vpop.permute.xlu1 %1598 }
 0xb54   : > { %v4098_v5 = vpop.eup %4097 }
 0xb55   : > { %v1442_v7 = vsel %vm955_vm5, %v4098_v5, 0.0 }
 0xb56   : > { %1443 = vadd.xlane.f32.xlu0 %v1442_v7  ;;  %v1973_v7 = vld [vmem:[%s4973_s15 + $0x28] sm:$0xff] }
 0xb6c   : > { %1447 = vrot.lane.b32.xlu0 %v4514_v19, %s4990_s24  ;;  %s5018_s24 = smov 72  }
 0xbe3   : > { %v1444_v8 = vpop.xlane.xlu0 %1443 }
 0xbe4   : > { %4099 = vrcp.f32 %v1444_v8 }
 0xbe7   : > { %v1448_v9 = vpop.permute.xlu0 %1447 }
 0xbe8   : > { %3776 = vmatpush3.msk.msra.mxu1 %vm973_vm6, %v1448_v9  ;;  %v1974_v9 = vld [vmem:[%s4973_s15 + $0x30] sm:$0xff] }
 0xbe9   : > { %3780 = vmatprep.subr.mxu1 %v4205_v6 }
 0xbee   : > { %v4100_v10 = vpop.eup %4099 }
 0xbef   : > { %v1446_v11 = vmul.f32 %v4100_v10, %v4098_v5  ;;  %v1972_v5 = vld [vmem:[%s4973_s15 + $0x20] sm:$0xff]  ;;  %v1975_v10 = vld [vmem:[%s4973_s15 + $0x38] sm:$0xff] }
 0xbf0   : > { %v3997_v8 = vpack.c.bf16 %v1973_v7, %v1972_v5 }
 0xbf1   : > { %3778 = vmatmul.mubr.msk.f32.vlgmr.msra.gmra.mrb[16].mxu1 %vm969_vm7, %v1446_v11  ;;  %v4000_v11 = vpack.c.bf16 %v1975_v10, %v1974_v9  ;;  %v3585_v9 = vld [vmem:[%s4967_s9 + $0x28] sm:$0xff] }
 0xbf2   : > { %3781 = vmatpush3.msra.mxu1 %v875_v12  ;;  %3782 = vmatprep.mubr.msk.f32.mxu1 %vm4204_vm2, %v4205_v6  ;;  %v3568_v12 = vld [vmem:[%s4972_s14] ss:$0 sm:$0xff] }
 0xbf3   : > { %3785 = vmatprep.subr.mxu1 %v4205_v6 }
 0xcc4   : > { %v1520_v14 = vpop.f32.mrb[16].mxu1 }
 0xcc5   : > { %v3779_v15 = vpop.f32.mrb[17].mxu1  ;;  %3783 = vmatmul.mubr.msk.f32.vlgmr.msra.gmra.mrb[18].mxu1 %vm880_vm4, %v1520_v14 }
 0xcc6   : > { %3786 = vmatpush3.xpose.msk.msra.mxu1 %vm880_vm4, %v1601_v13  ;;  %3787 = vmatprep.mubr.msk.f32.mxu1 %vm4204_vm2, %v4205_v6 }
 0xcc7   : > { %3795 = vmatprep.subr.mxu1 %v4205_v6 }
 0xcc9   : > { %3788 = vmatmul.mubr.msk.f32.vlgmr.msra.gmra.mrb[20].mxu1 %vm880_vm4, %v1599_v16 }
 0xcca   : > { %3797 = vmatprep.mubr.msk.f32.mxu1 %vm4204_vm2, %v4205_v6  ;;  %3796 = vmatpush3.msra.mxu1 %v876_v30 }
 0xccb   : > { %3990 = vmatprep.subr.bf16.mxu1 %v4203_v3 }
 0xd98   : > { %v1593_v17 = vpop.f32.mrb[18].mxu1 }
 0xd99   : > { %v1597_v18 = vadd.f32 %v1593_v17, %v1355_v60  ;;  %v3784_v20 = vpop.f32.mrb[19].mxu1 }
 0xd9c   : > { %v1672_v21 = vpop.f32.mrb[20].mxu1 }
 0xd9d   : > { %v3789_v22 = vpop.f32.mrb[21].mxu1  ;;  %v1676_v23 = vsel %vm955_vm5, %v1672_v21, -inf }
 0xd9e   : > { %1677 = vmax.xlane.f32.xlu0 %v1676_v23  ;;  %v3571_v23 = vld [vmem:[%s4974_s16] ss:$0 sm:$0xff] }
 0xdb4   : > { %1687 = vrot.lane.b32.xlu0 %v4514_v19, %s4988_s26  ;;  %s5016_s26 = smov 48  }
 0xe2b   : > { %v1678_v24 = vpop.xlane.xlu0 %1677 }
 0xe2c   : > { %v1679_v25 = vsub.f32 %v1672_v21, %v1678_v24 }
 0xe2e   : > { %v1680_v26 = vmul.f32 1.442695, %v1679_v25 }
 0xe2f   : > { %v1688_v27 = vpop.permute.xlu0 %1687 }
 0xe30   : > { %4101 = vpow2.f32 %v1680_v26  ;;  %3791 = vmatpush3.msk.msra.mxu0 %vm973_vm6, %v1688_v27 }
 0xe31   : > { %3984 = vmatprep.subr.bf16.mxu0 %v4203_v3 }
 0xe3a   : > { %v4102_v28 = vpop.eup %4101 }
 0xe3b   : > { %v1682_v29 = vsel %vm955_vm5, %v4102_v28, 0.0 }
 0xe3c   : > { %1683 = vadd.xlane.f32.xlu1 %v1682_v29 }
 0xec9   : > { %v1684_v19 = vpop.xlane.xlu1 %1683 }
 0xeca   : > { %4103 = vrcp.f32 %v1684_v19 }
 0xed4   : > { %v4104_v31 = vpop.eup %4103 }
 0xed5   : > { %v1686_v32 = vmul.f32 %v4104_v31, %v4102_v28 }
 0xed7   : > { %3793 = vmatmul.mubr.msk.f32.vlgmr.msra.gmra.mrb[2].mxu0 %vm969_vm7, %v1686_v32 }
 0xed8   : > { %3808 = vmatprep.mubr.msk.f32.mxu0 %vm4204_vm2, %v4205_v6 }
 0xfaa   : > { %v1760_v33 = vpop.f32.mrb[2].mxu0 }
 0xfab   : > { %v3794_v34 = vpop.f32.mrb[3].mxu0  ;;  %3798 = vmatmul.mubr.msk.f32.vlgmr.msra.gmra.mrb[22].mxu1 %vm880_vm4, %v1760_v33  ;;  %v3577_v33 = vld [vmem:[%s4965_s7 + $0x20] sm:$0xff] }
 0xfac   : > { %3827 = vmatprep.mubr.msk.f32.mxu1 %vm4204_vm2, %v4205_v6  ;;  %3992 = vmatpush3.bf16.msra.mxu1 %v3991_v0  ;;  %v3578_v34 = vld [vmem:[%s4965_s7 + $0x28] sm:$0xff] }
 0xfad   : > { %3993 = vmatprep.subr.bf16.mxu1 %v4203_v3 }
 0xfb0   : > { %3995 = vmatpush3.bf16.msra.mxu1 %v3994_v4 }
 0xfb1   : > { %3996 = vmatprep.subr.bf16.mxu1 %v4203_v3 }
 0xfb4   : > { %3998 = vmatpush3.bf16.msra.mxu1 %v3997_v8 }
 0xfb5   : > { %3999 = vmatprep.subr.bf16.mxu1 %v4203_v3 }
 0xfb8   : > { %4001 = vmatpush3.bf16.msra.mxu1 %v4000_v11 }
 0xfb9   : > { %3846 = vmatprep.subr.mxu1 %v4205_v6 }
0x107e   : > { %v1833_v35 = vpop.f32.mrb[22].mxu1 }
0x107f   : > { %v1837_v36 = vadd.f32 %v1833_v35, %v1597_v18  ;;  %v3799_v37 = vpop.f32.mrb[23].mxu1  ;;  %v4003_v35 = vpack.c.bf16 %v3578_v34, %v3577_v33 }
0x1080   : > { %v3580_v37 = vld [vmem:[%s4965_s7 + $0x38] sm:$0xff] }
0x1081   : > { %v1838_v39 = vadd.f32 %v1837_v36, %v4477_v57  ;;  %v1877_v57 = vld [vmem:[%s4971_s13 + $0x8] sm:$0xff]  ;;  %v3579_v36 = vld [vmem:[%s4965_s7 + $0x30] sm:$0xff] }
0x1082   : > { %v3985_v48 = vpack.c.bf16 %v1877_v57, %v1876_v47  ;;  %v3582_v57 = vld [vmem:[%s4966_s8 + $0x1] ss:$0 sm:$0xff] }
0x1083   : > { %v4619_v40 = vadd.f32 %v3565_v38, %v1838_v39  ;;  %v4006_v38 = vpack.c.bf16 %v3580_v37, %v3579_v36 }
0x1084   : > { %3986 = vmatpush3.bf16.msra.mxu0 %v3985_v48 }
0x1085   : > { %v1849_v41 = vsel %vm730_vm1, %v4619_v40, 0.0  ;;  %3987 = vmatprep.subr.bf16.mxu0 %v4203_v3 }
0x1086   : > { %1850 = vadd.xlane.f32.xlu1 %v1849_v41 }
0x1088   : > { %3989 = vmatpush3.bf16.msra.mxu0 %v3988_v51 }
0x1089   : > { %4002 = vmatprep.subr.bf16.mxu0 %v4203_v3 }
0x1113   : > { %v1851_v42 = vpop.xlane.xlu1 %1850 }
0x1114   : > { %v1852_v43 = vmul.f32 0.03125, %v1851_v42 }
0x1116   : > { %v1853_v44 = vsub.f32 %v4619_v40, %v1852_v43  ;;  %v3575_v43 = vld [vmem:[%s4963_s5 + $0x1] ss:$0 sm:$0xff] }
0x1118   : > { %v1854_v45 = vmul.f32 %v1853_v44, %v1853_v44 }
0x111a   : > { %v1855_v46 = vsel %vm730_vm1, %v1854_v45, 0.0  ;;  %v3576_v45 = vld [vmem:[%s4964_s6 + $0x1] ss:$0 sm:$0xff] }
0x111b   : > { %1856 = vadd.xlane.f32.xlu1 %v1855_v46 }
0x11a8   : > { %v1857_v52 = vpop.xlane.xlu1 %1856 }
0x11a9   : > { %v1858_v53 = vmul.f32 0.03125, %v1857_v52 }
0x11ab   : > { %v1859_v54 = vadd.f32 1e-05, %v1858_v53 }
0x11ad   : > { %4105 = vrsqrt.f32 %v1859_v54 }
0x11b7   : > { %v4106_v55 = vpop.eup %4105 }
0x11b8   : > { %v1861_v58 = vmul.f32 %v4106_v55, %v1853_v44 }
0x11ba   : > { %v1868_v60 = vmul.f32 %v3566_v56, %v1861_v58 }
0x11bc   : > { %v1875_v61 = vadd.f32 %v3567_v59, %v1868_v60 }
0x11be   : > { %3809 = vmatmul.mubr.msk.f32.vlgmr.msra.gmra.mrb[4].mxu0 %vm799_vm3, %v1875_v61 }
0x11bf   : > { %3838 = vmatprep.mubr.msk.f32.mxu0 %vm4204_vm2, %v4205_v6  ;;  %4004 = vmatpush3.bf16.msra.mxu0 %v4003_v35 }
0x11c0   : > { %4005 = vmatprep.subr.bf16.mxu0 %v4203_v3 }
0x11c3   : > { %4007 = vmatpush3.bf16.msra.mxu0 %v4006_v38 }
0x11c4   : > { %3841 = vmatprep.subr.mxu0 %v4205_v6 }
0x1291   : > { %v1956_v13 = vpop.f32.mrb[4].mxu0 }
0x1292   : > { %v1957_v14 = vadd.f32 %v3568_v12, %v1956_v13  ;;  %v3810_v15 = vpop.f32.mrb[5].mxu0 }
0x1294   : > { %v3570_v16 = vmul.f32 -1.702, %v1957_v14 }
0x1296   : > { %v1962_v17 = vmul.f32 1.442695, %v3570_v16 }
0x1298   : > { %4107 = vpow2.f32 %v1962_v17 }
0x12a2   : > { %v4108_v18 = vpop.eup %4107 }
0x12a3   : > { %v1964_v20 = vadd.f32 1.0, %v4108_v18  ;;  %v3584_v18 = vld [vmem:[%s4967_s9 + $0x20] sm:$0xff] }
0x12a5   : > { %4109 = vrcp.f32 %v1964_v20 }
0x12af   : > { %v4110_v21 = vpop.eup %4109 }
0x12b0   : > { %v1967_v22 = vmul.f32 %v4110_v21, %v1957_v14 }
0x12b2   : > { %3828 = vmatmul.mubr.msk.f32.vlgmr.msra.gmra.mrb[24].mxu1 %vm654_vm0, %v1967_v22 }
0x12b3   : > { %3848 = vmatprep.mubr.msk.f32.mxu1 %vm4204_vm2, %v4205_v6 }
0x1385   : > { %v2052_v24 = vpop.f32.mrb[24].mxu1 }
0x1386   : > { %v2053_v25 = vadd.f32 %v3571_v23, %v2052_v24  ;;  %v3829_v26 = vpop.f32.mrb[25].mxu1 }
0x1388   : > { %v4686_v27 = vadd.f32 %v2053_v25, %v4619_v40 }
0x138a   : > { %v2061_v28 = vsel %vm730_vm1, %v4686_v27, 0.0 }
0x138b   : > { %2062 = vadd.xlane.f32.xlu1 %v2061_v28 }
0x1418   : > { %v2063_v29 = vpop.xlane.xlu1 %2062 }
0x1419   : > { %v2064_v30 = vmul.f32 0.03125, %v2063_v29 }
0x141b   : > { %v2065_v19 = vsub.f32 %v4686_v27, %v2064_v30 }
0x141d   : > { %v2066_v31 = vmul.f32 %v2065_v19, %v2065_v19 }
0x141f   : > { %v2067_v32 = vsel %vm730_vm1, %v2066_v31, 0.0 }
0x1420   : > { %2068 = vadd.xlane.f32.xlu1 %v2067_v32 }
0x14ad   : > { %v2069_v39 = vpop.xlane.xlu1 %2068 }
0x14ae   : > { %v2070_v40 = vmul.f32 0.03125, %v2069_v39 }
0x14b0   : > { %v2071_v41 = vadd.f32 1e-05, %v2070_v40 }
0x14b2   : > { %4111 = vrsqrt.f32 %v2071_v41 }
0x14bc   : > { %v4112_v42 = vpop.eup %4111 }
0x14bd   : > { %v2073_v44 = vmul.f32 %v4112_v42, %v2065_v19 }
0x14bf   : > { %v2080_v46 = vmul.f32 %v3575_v43, %v2073_v44 }
0x14c1   : > { %v2087_v47 = vadd.f32 %v3576_v45, %v2080_v46  ;;  %v3586_v45 = vld [vmem:[%s4967_s9 + $0x30] sm:$0xff] }
0x14c3   : > { %3839 = vmatmul.mubr.msk.f32.vlgmr.msra.gmra.mrb[6].mxu0 %vm799_vm3, %v2087_v47 }
0x14c4   : > { %3843 = vmatprep.mubr.msk.f32.mxu0 %vm4204_vm2, %v4205_v6 }
0x1596   : > { %v2170_v48 = vpop.f32.mrb[6].mxu0 }
0x1597   : > { %v4718_v49 = vadd.f32 %v3582_v57, %v2170_v48  ;;  %v3840_v50 = vpop.f32.mrb[7].mxu0 }
0x1599   : > { %2346 = vrot.lane.b32.xlu1 %v4718_v49, %s4207_s25  ;;  %2180 = vrot.lane.b32.xlu0 %v4718_v49, %s4206_s0  ;;  %s5013_s0 = smov 112   ;;  %s5014_s25 = smov 64  }
0x159d   : > { %2344 = vrot.lane.b32.xlu0 %v4718_v49, %s4209_s29  ;;  %s5015_s29 = smov 80  }
0x160b   : > { %v2181_v51 = vpop.permute.xlu0 %2180  ;;  %v2347_v52 = vpop.permute.xlu1 %2346 }
0x160c   : > { %3842 = vmatpush3.xpose.msk.msra.mxu0 %vm880_vm4, %v2181_v51 }
0x160d   : > { %3851 = vmatprep.subr.mxu0 %v4205_v6 }
0x160f   : > { %3844 = vmatmul.mubr.msk.f32.vlgmr.msra.gmra.mrb[8].mxu0 %vm880_vm4, %v4718_v49  ;;  %v2345_v53 = vpop.permute.xlu0 %2344 }
0x1610   : > { %3852 = vmatpush3.xpose.msk.msra.mxu0 %vm880_vm4, %v2347_v52  ;;  %3853 = vmatprep.mubr.msk.f32.mxu0 %vm4204_vm2, %v4205_v6 }
0x1611   : > { %3861 = vmatprep.subr.mxu0 %v4205_v6 }
0x1613   : > { %3854 = vmatmul.mubr.msk.f32.vlgmr.msra.gmra.mrb[10].mxu0 %vm880_vm4, %v2345_v53 }
0x1614   : > { %3863 = vmatprep.mubr.msk.f32.mxu0 %vm4204_vm2, %v4205_v6  ;;  %3862 = vmatpush3.msra.mxu0 %v3585_v9 }
0x1615   : > { %3871 = vmatprep.subr.mxu0 %v4205_v6 }
0x16e2   : > { %v2252_v54 = vpop.f32.mrb[8].mxu0 }
0x16e3   : > { %v3845_v55 = vpop.f32.mrb[9].mxu0  ;;  %v2256_v56 = vsel %vm955_vm5, %v2252_v54, -inf }
0x16e4   : > { %2257 = vmax.xlane.f32.xlu0 %v2256_v56  ;;  %v3587_v56 = vld [vmem:[%s4967_s9 + $0x38] sm:$0xff] }
0x16e6   : > { %v2418_v58 = vpop.f32.mrb[10].mxu0 }
0x16e7   : > { %v3855_v59 = vpop.f32.mrb[11].mxu0  ;;  %v2422_v60 = vsel %vm955_vm5, %v2418_v58, -inf }
0x16e8   : > { %2423 = vmax.xlane.f32.xlu1 %v2422_v60 }
0x16f9   : > { %2433 = vrot.lane.b32.xlu1 %v4718_v49, %s4210_s3 }
0x16fd   : > { %2656 = vrot.lane.b32.xlu1 %v4718_v49, %s5013_s0  ;;  %s5019_s0 = smov 40  }
0x1771   : > { %v2258_v61 = vpop.xlane.xlu0 %2257 }
0x1772   : > { %v2259_v62 = vsub.f32 %v2252_v54, %v2258_v61 }
0x1774   : > { %v2260_v63 = vmul.f32 1.442695, %v2259_v62 }
0x1775   : > { %v2424_v0 = vpop.xlane.xlu1 %2423 }
0x1776   : > { %4113 = vpow2.f32 %v2260_v63  ;;  %v2425_v1 = vsub.f32 %v2418_v58, %v2424_v0 }
0x1778   : > { %v2426_v2 = vmul.f32 1.442695, %v2425_v1 }
0x1779   : > { %v2434_v15 = vpop.permute.xlu1 %2433 }
0x177a   : > { %4115 = vpow2.f32 %v2426_v2 }
0x177d   : > { %v2657_v25 = vpop.permute.xlu1 %2656 }
0x1780   : > { %v4114_v4 = vpop.eup %4113 }
0x1781   : > { %v2262_v5 = vsel %vm955_vm5, %v4114_v4, 0.0 }
0x1782   : > { %2263 = vadd.xlane.f32.xlu0 %v2262_v5 }
0x1784   : > { %v4116_v7 = vpop.eup %4115 }
0x1785   : > { %v2428_v8 = vsel %vm955_vm5, %v4116_v7, 0.0 }
0x1786   : > { %2429 = vadd.xlane.f32.xlu0 %v2428_v8 }
0x179c   : > { %2267 = vrot.lane.b32.xlu0 %v4718_v49, %s5014_s25  ;;  %s620_s25 = sand.u32 1, %s4193_s22  }
0x179d   : > { %s621_s3 = scalar_lea.vmem [#allocation2], %s620_s25 }
0x179e   : > { %s3477_s23 = sshll.u32 %s621_s3, 4  ;;  %s4917_s23 = int_to_ptr.vmem [resolvable:$true] %s3477_s23 }
0x179f   : > { %s4139_s1 = scalar_lea.vmem %s4917_s23, 16 }
0x17a0   : > { %2658 = vrot.lane.b32.xlu0 %v4718_v49, %s5015_s29  ;;  %s3634_s29 = sshll.u32 %s4344_s2, 4  ;;  %p4140_p11 = scmp.ne.s32.totalorder %s4917_s23, %s4139_s1 }
0x17a1   : > { %s4217_s2 = smov [#allocation2]  }
0x17a2   : > { %p4141_p12 = pnand %p4140_p11, %p4361_p5  ;;  %s4143_s30 = sshll.u32 %s4217_s2, 4  ;;  %s4144_s30 = int_to_ptr.vmem [resolvable:$false] %s4143_s30 }
0x17a3   : > { %p4146_p0 = scmp.lt.s32.totalorder %s4917_s23, %s4144_s30 }
0x17a4   : > { %p4142_p13 = pneg %p4141_p12 }
0x180f   : > { %v2264_v10 = vpop.xlane.xlu0 %2263 }
0x1810   : > { %4117 = vrcp.f32 %v2264_v10 }
0x1813   : > { %v2430_v11 = vpop.xlane.xlu0 %2429 }
0x1814   : > { %4119 = vrcp.f32 %v2430_v11 }
0x1817   : > { %v2268_v12 = vpop.permute.xlu0 %2267 }
0x1818   : > { %3847 = vmatpush3.msk.msra.mxu1 %vm973_vm6, %v2268_v12 }
0x1819   : > { %3856 = vmatprep.subr.mxu1 %v4205_v6 }
0x181a   : > { %v4118_v13 = vpop.eup %4117 }
0x181b   : > { %v2266_v14 = vmul.f32 %v4118_v13, %v4114_v4  ;;  %v2659_v23 = vpop.permute.xlu0 %2658 }
0x181d   : > { %3849 = vmatmul.mubr.msk.f32.vlgmr.msra.gmra.mrb[26].mxu1 %vm969_vm7, %v2266_v14 }
0x181e   : > { %v4120_v16 = vpop.eup %4119  ;;  %3857 = vmatpush3.msk.msra.mxu1 %vm973_vm6, %v2434_v15  ;;  %3858 = vmatprep.mubr.msk.f32.mxu1 %vm4204_vm2, %v4205_v6 }
0x181f   : > { %v2432_v17 = vmul.f32 %v4120_v16, %v4116_v7  ;;  %3866 = vmatprep.subr.mxu1 %v4205_v6  ;;  %v3609_v7 = vld [vmem:[%s4968_s10 + $0x1] ss:$0 sm:$0xff] }
0x1820   : > { %v3614_v16 = vld [vmem:[%s4971_s13 + $0x20] sm:$0xff] }
0x1821   : > { %3859 = vmatmul.mubr.msk.f32.vlgmr.msra.gmra.mrb[28].mxu1 %vm969_vm7, %v2432_v17 }
0x1822   : > { %3868 = vmatprep.mubr.msk.f32.mxu1 %vm4204_vm2, %v4205_v6  ;;  %3867 = vmatpush3.msra.mxu1 %v3584_v18  ;;  %v3616_v18 = vld [vmem:[%s4971_s13 + $0x30] sm:$0xff] }
0x1823   : > { %3876 = vmatprep.subr.mxu1 %v4205_v6 }
0x18f0   : > { %v2340_v20 = vpop.f32.mrb[26].mxu1 }
0x18f1   : > { %v3850_v21 = vpop.f32.mrb[27].mxu1  ;;  %3869 = vmatmul.mubr.msk.f32.vlgmr.msra.gmra.mrb[30].mxu1 %vm880_vm4, %v2340_v20  ;;  %v3617_v20 = vld [vmem:[%s4971_s13 + $0x38] sm:$0xff] }
0x18f2   : > { %3878 = vmatprep.mubr.msk.f32.mxu1 %vm4204_vm2, %v4205_v6  ;;  %v4012_v21 = vpack.c.bf16 %v3617_v20, %v3616_v18 }
0x18f4   : > { %v2506_v22 = vpop.f32.mrb[28].mxu1 }
0x18f5   : > { %v3860_v24 = vpop.f32.mrb[29].mxu1  ;;  %3864 = vmatmul.mubr.msk.f32.vlgmr.msra.gmra.mrb[12].mxu0 %vm880_vm4, %v2506_v22 }
0x18f6   : > { %3872 = vmatpush3.xpose.msk.msra.mxu0 %vm880_vm4, %v2659_v23  ;;  %3873 = vmatprep.mubr.msk.f32.mxu0 %vm4204_vm2, %v4205_v6 }
0x18f7   : > { %3881 = vmatprep.subr.mxu0 %v4205_v6 }
0x18f9   : > { %3874 = vmatmul.mubr.msk.f32.vlgmr.msra.gmra.mrb[14].mxu0 %vm880_vm4, %v2657_v25 }
0x18fa   : > { %3883 = vmatprep.mubr.msk.f32.mxu0 %vm4204_vm2, %v4205_v6  ;;  %3882 = vmatpush3.msra.mxu0 %v3586_v45 }
0x18fb   : > { %3891 = vmatprep.subr.mxu0 %v4205_v6 }
0x19c4   : > { %v2652_v26 = vpop.f32.mrb[30].mxu1 }
0x19c5   : > { %v3870_v28 = vpop.f32.mrb[31].mxu1 }
0x19c8   : > { %v2579_v29 = vpop.f32.mrb[12].mxu0 }
0x19c9   : > { %v2653_v30 = vadd.f32 %v2652_v26, %v2579_v29  ;;  %v3865_v19 = vpop.f32.mrb[13].mxu0  ;;  %v3612_v26 = vld [vmem:[%s4969_s11 + $0x1] ss:$0 sm:$0xff] }
0x19ca   : > { %v3613_v29 = vld [vmem:[%s4970_s12 + $0x1] ss:$0 sm:$0xff] }
0x19cc   : > { %v2730_v31 = vpop.f32.mrb[14].mxu0 }
0x19cd   : > { %v3875_v32 = vpop.f32.mrb[15].mxu0  ;;  %v2734_v33 = vsel %vm955_vm5, %v2730_v31, -inf }
0x19ce   : > { %2735 = vmax.xlane.f32.xlu0 %v2734_v33  ;;  %v3623_v32 = vld [vmem:[%s4973_s15 + $0x48] sm:$0xff] }
0x19e4   : > { %2745 = vrot.lane.b32.xlu0 %v4718_v49, %s5016_s26  ;;  %s5020_s26 = sld [smem:[#allocation16_spill]] }
0x19e8   : > { %2896 = vrot.lane.b32.xlu0 %v4718_v49, %s5017_s28 }
0x19ea   : > { %s4915_s28 = scalar_lea.hbm %s5020_s26, %s3634_s29 }
0x1a5b   : > { %v2736_v34 = vpop.xlane.xlu0 %2735 }
0x1a5c   : > { %v2737_v35 = vsub.f32 %v2730_v31, %v2736_v34  ;;  %v3622_v31 = vld [vmem:[%s4973_s15 + $0x40] sm:$0xff]  ;;  %v3624_v34 = vld [vmem:[%s4973_s15 + $0x50] sm:$0xff] }
0x1a5d   : > { %v4015_v33 = vpack.c.bf16 %v3623_v32, %v3622_v31 }
0x1a5e   : > { %v2738_v36 = vmul.f32 1.442695, %v2737_v35 }
0x1a5f   : > { %v2746_v37 = vpop.permute.xlu0 %2745 }
0x1a60   : > { %4121 = vpow2.f32 %v2738_v36  ;;  %3877 = vmatpush3.msk.msra.mxu1 %vm973_vm6, %v2746_v37  ;;  %v3626_v36 = vld [vmem:[%s4973_s15 + $0x60] sm:$0xff]  ;;  %v3627_v37 = vld [vmem:[%s4973_s15 + $0x68] sm:$0xff] }
0x1a61   : > { %3886 = vmatprep.subr.mxu1 %v4205_v6 }
0x1a63   : > { %v2897_v44 = vpop.permute.xlu0 %2896 }
0x1a6a   : > { %v4122_v38 = vpop.eup %4121 }
0x1a6b   : > { %v2740_v39 = vsel %vm955_vm5, %v4122_v38, 0.0 }
0x1a6c   : > { %2741 = vadd.xlane.f32.xlu1 %v2740_v39  ;;  %v3628_v39 = vld [vmem:[%s4973_s15 + $0x70] sm:$0xff] }
0x1a7d   : > { %2898 = vrot.lane.b32.xlu1 %v4718_v49, %s5018_s24  ;;  %s3465_s24 = scalar_lea.sflag [#allocation3], %s620_s25 }
0x1af9   : > { %v2742_v40 = vpop.xlane.xlu1 %2741 }
0x1afa   : > { %4123 = vrcp.f32 %v2742_v40  ;;  %v3629_v40 = vld [vmem:[%s4973_s15 + $0x78] sm:$0xff] }
0x1afd   : > { %v2899_v43 = vpop.permute.xlu1 %2898 }
0x1b04   : > { %v4124_v41 = vpop.eup %4123 }
0x1b05   : > { %v2744_v42 = vmul.f32 %v4124_v41, %v4122_v38  ;;  %v4021_v38 = vpack.c.bf16 %v3627_v37, %v3626_v36  ;;  %v4024_v41 = vpack.c.bf16 %v3629_v40, %v3628_v39 }
0x1b07   : > { %3879 = vmatmul.mubr.msk.f32.vlgmr.msra.gmra.mrb[32].mxu1 %vm969_vm7, %v2744_v42  ;;  %v3619_v42 = vld [vmem:[%s4972_s14 + $0x1] ss:$0 sm:$0xff] }
0x1b08   : > { %3887 = vmatpush3.xpose.msk.msra.mxu1 %vm880_vm4, %v2899_v43  ;;  %3888 = vmatprep.mubr.msk.f32.mxu1 %vm4204_vm2, %v4205_v6 }
0x1b09   : > { %3896 = vmatprep.subr.mxu1 %v4205_v6 }
0x1b0b   : > { %3889 = vmatmul.mubr.msk.f32.vlgmr.msra.gmra.mrb[34].mxu1 %vm880_vm4, %v2897_v44 }
0x1b0c   : > { %3898 = vmatprep.mubr.msk.f32.mxu1 %vm4204_vm2, %v4205_v6  ;;  %3897 = vmatpush3.msra.mxu1 %v3587_v56 }
0x1b0d   : > { %4014 = vmatprep.subr.bf16.mxu1 %v4203_v3 }
0x1bda   : > { %v2818_v46 = vpop.f32.mrb[32].mxu1 }
0x1bdb   : > { %v3880_v47 = vpop.f32.mrb[33].mxu1  ;;  %3884 = vmatmul.mubr.msk.f32.vlgmr.msra.gmra.mrb[16].mxu0 %vm880_vm4, %v2818_v46 }
0x1bdc   : > { %3893 = vmatprep.mubr.msk.f32.mxu0 %vm4204_vm2, %v4205_v6 }
0x1bde   : > { %v2970_v57 = vpop.f32.mrb[34].mxu1 }
0x1bdf   : > { %v3890_v48 = vpop.f32.mrb[35].mxu1  ;;  %v2974_v50 = vsel %vm955_vm5, %v2970_v57, -inf }
0x1be0   : > { %2975 = vmax.xlane.f32.xlu1 %v2974_v50 }
0x1c6d   : > { %v2976_v51 = vpop.xlane.xlu1 %2975 }
0x1c6e   : > { %v2977_v52 = vsub.f32 %v2970_v57, %v2976_v51 }
0x1c70   : > { %v2978_v53 = vmul.f32 1.442695, %v2977_v52  ;;  %v3631_v52 = vld [vmem:[%s4974_s16 + $0x1] ss:$0 sm:$0xff] }
0x1c72   : > { %4125 = vpow2.f32 %v2978_v53 }
0x1c7c   : > { %v4126_v54 = vpop.eup %4125 }
0x1c7d   : > { %v2980_v55 = vsel %vm955_vm5, %v4126_v54, 0.0 }
0x1c7e   : > { %2981 = vadd.xlane.f32.xlu0 %v2980_v55 }
0x1c94   : > { %2985 = vrot.lane.b32.xlu0 %v4718_v49, %s5019_s0  ;;  %s4145_s0 = scalar_lea.vmem %s4144_s30, 32 }
0x1c95   : > { %p4147_p1 = scmp.lt.s32.totalorder %s4145_s0, %s4139_s1 }
0x1c97   : > { %p4148_p2 = por %p4147_p1, %p4146_p0 }
0x1c99   : > { %p4149_p3 = pnand %p4148_p2, %p4142_p13 }
0x1cae   : > { %v2891_v58 = vpop.f32.mrb[16].mxu0 }
0x1caf   : > { %v2895_v59 = vadd.f32 %v2891_v58, %v2653_v30  ;;  %v3885_v60 = vpop.f32.mrb[17].mxu0 }
0x1d0b   : > { %v2982_v61 = vpop.xlane.xlu0 %2981 }
0x1d0c   : > { %4127 = vrcp.f32 %v2982_v61 }
0x1d0f   : > { %v2986_v62 = vpop.permute.xlu0 %2985 }
0x1d10   : > { %3892 = vmatpush3.msk.msra.mxu0 %vm973_vm6, %v2986_v62 }
0x1d11   : > { %4008 = vmatprep.subr.bf16.mxu0 %v4203_v3 }
0x1d16   : > { %v4128_v63 = vpop.eup %4127 }
0x1d17   : > { %v2984_v0 = vmul.f32 %v4128_v63, %v4126_v54 }
0x1d19   : > { %3894 = vmatmul.mubr.msk.f32.vlgmr.msra.gmra.mrb[18].mxu0 %vm969_vm7, %v2984_v0  ;;  %v3380_v0 = vld [vmem:[%s4977_s19] sm:$0xff] }
0x1d1a   : > { %3909 = vmatprep.mubr.msk.f32.mxu0 %vm4204_vm2, %v4205_v6 }
0x1dec   : > { %v3058_v49 = vpop.f32.mrb[18].mxu0 }
0x1ded   : > { %v3895_v1 = vpop.f32.mrb[19].mxu0  ;;  %3899 = vmatmul.mubr.msk.f32.vlgmr.msra.gmra.mrb[36].mxu1 %vm880_vm4, %v3058_v49  ;;  %v3381_v49 = vld [vmem:[%s4977_s19 + $0x8] sm:$0xff] }
0x1dee   : > { %3928 = vmatprep.mubr.msk.f32.mxu1 %vm4204_vm2, %v4205_v6  ;;  %4016 = vmatpush3.bf16.msra.mxu1 %v4015_v33  ;;  %v4027_v1 = vpack.c.bf16 %v3381_v49, %v3380_v0 }
0x1def   : > { %4017 = vmatprep.subr.bf16.mxu1 %v4203_v3 }
0x1ec0   : > { %v3131_v2 = vpop.f32.mrb[36].mxu1 }
0x1ec1   : > { %v3135_v4 = vadd.f32 %v3131_v2, %v2895_v59  ;;  %v3900_v5 = vpop.f32.mrb[37].mxu1  ;;  %v3382_v2 = vld [vmem:[%s4977_s19 + $0x10] sm:$0xff] }
0x1ec3   : > { %v3136_v8 = vadd.f32 %v3135_v4, %v4686_v27  ;;  %v3615_v27 = vld [vmem:[%s4971_s13 + $0x28] sm:$0xff]  ;;  %v3383_v4 = vld [vmem:[%s4977_s19 + $0x18] sm:$0xff] }
0x1ec4   : > { %v4009_v17 = vpack.c.bf16 %v3615_v27, %v3614_v16  ;;  %v4030_v5 = vpack.c.bf16 %v3383_v4, %v3382_v2 }
0x1ec5   : > { %v4823_v9 = vadd.f32 %v3609_v7, %v3136_v8 }
0x1ec6   : > { %4010 = vmatpush3.bf16.msra.mxu0 %v4009_v17 }
0x1ec7   : > { %v3150_v10 = vsel %vm730_vm1, %v4823_v9, 0.0  ;;  %4011 = vmatprep.subr.bf16.mxu0 %v4203_v3 }
0x1ec8   : > { %3151 = vadd.xlane.f32.xlu1 %v3150_v10 }
0x1eca   : > { %4013 = vmatpush3.bf16.msra.mxu0 %v4012_v21 }
0x1ecb   : > { %4026 = vmatprep.subr.bf16.mxu0 %v4203_v3 }
0x1f55   : > { %v3152_v11 = vpop.xlane.xlu1 %3151 }
0x1f56   : > { %v3153_v12 = vmul.f32 0.03125, %v3152_v11  ;;  %v3362_v11 = vld [vmem:[%s4975_s17] sm:$0x1] }
0x1f58   : > { %v3154_v13 = vsub.f32 %v4823_v9, %v3153_v12 }
0x1f5a   : > { %v3155_v14 = vmul.f32 %v3154_v13, %v3154_v13 }
0x1f5c   : > { %v3156_v15 = vsel %vm730_vm1, %v3155_v14, 0.0 }
0x1f5d   : > { %3157 = vadd.xlane.f32.xlu1 %v3156_v15 }
0x1fea   : > { %v3158_v22 = vpop.xlane.xlu1 %3157 }
0x1feb   : > { %v3159_v23 = vmul.f32 0.03125, %v3158_v22 }
0x1fed   : > { %v3160_v24 = vadd.f32 1e-05, %v3159_v23 }
0x1fef   : > { %4129 = vrsqrt.f32 %v3160_v24 }
0x1ff9   : > { %v4130_v25 = vpop.eup %4129 }
0x1ffa   : > { %v3162_v28 = vmul.f32 %v4130_v25, %v3154_v13  ;;  %v3363_v13 = vld [vmem:[%s4976_s18] sm:$0x1] }
0x1ffc   : > { %v3169_v30 = vmul.f32 %v3612_v26, %v3162_v28 }
0x1ffe   : > { %v3176_v19 = vadd.f32 %v3613_v29, %v3169_v30 }
0x2000   : > { %3910 = vmatmul.mubr.msk.f32.vlgmr.msra.gmra.mrb[20].mxu0 %vm799_vm3, %v3176_v19 }
0x2001   : > { %3939 = vmatprep.mubr.msk.f32.mxu0 %vm4204_vm2, %v4205_v6  ;;  %v3625_v6 = vld [vmem:[%s4973_s15 + $0x58] sm:$0xff]  ;;  %4028 = vmatpush3.bf16.msra.mxu0 %v4027_v1 }
0x2002   : > { %v4018_v35 = vpack.c.bf16 %v3625_v6, %v3624_v34  ;;  %4029 = vmatprep.subr.bf16.mxu0 %v4203_v3 }
0x2004   : > { %4019 = vmatpush3.bf16.msra.mxu1 %v4018_v35 }
0x2005   : > { %4020 = vmatprep.subr.bf16.mxu1 %v4203_v3  ;;  %4031 = vmatpush3.bf16.msra.mxu0 %v4030_v5 }
0x2008   : > { %4022 = vmatpush3.bf16.msra.mxu1 %v4021_v38 }
0x2009   : > { %4023 = vmatprep.subr.bf16.mxu1 %v4203_v3 }
0x200c   : > { %4025 = vmatpush3.bf16.msra.mxu1 %v4024_v41 }
0x20d3   : > { %v3259_v43 = vpop.f32.mrb[20].mxu0 }
0x20d4   : > { %v3260_v44 = vadd.f32 %v3619_v42, %v3259_v43  ;;  %v3911_v45 = vpop.f32.mrb[21].mxu0 }
0x20d6   : > { %v3621_v46 = vmul.f32 -1.702, %v3260_v44 }
0x20d8   : > { %v3265_v47 = vmul.f32 1.442695, %v3621_v46 }
0x20da   : > { %4131 = vpow2.f32 %v3265_v47 }
0x20e4   : > { %v4132_v57 = vpop.eup %4131 }
0x20e5   : > { %v3267_v48 = vadd.f32 1.0, %v4132_v57 }
0x20e7   : > { %4133 = vrcp.f32 %v3267_v48 }
0x20f1   : > { %v4134_v50 = vpop.eup %4133 }
0x20f2   : > { %v3270_v51 = vmul.f32 %v4134_v50, %v3260_v44 }
0x20f4   : > { %3929 = vmatmul.mubr.msk.f32.vlgmr.msra.gmra.mrb[38].mxu1 %vm654_vm0, %v3270_v51 }
0x21c7   : > { %v3357_v53 = vpop.f32.mrb[38].mxu1 }
0x21c8   : > { %v3358_v54 = vadd.f32 %v3631_v52, %v3357_v53  ;;  %v3930_v55 = vpop.f32.mrb[39].mxu1 }
0x21ca   : > { %v3361_v56 = vadd.f32 %v3358_v54, %v4823_v9 }
0x21cc   : > { %v3365_v58 = vsel %vm3364_vm8, %v3361_v56, 0.0 }
0x21cd   : > { %3366 = vadd.xlane.f32.xlu1 %v3365_v58 }
0x225a   : > { %v3367_v59 = vpop.xlane.xlu1 %3366 }
0x225b   : > { %v3368_v60 = vmul.f32 0.03125, %v3367_v59 }
0x225d   : > { %v3369_v61 = vsub.f32 %v3361_v56, %v3368_v60 }
0x225f   : > { %v3370_v62 = vmul.f32 %v3369_v61, %v3369_v61 }
0x2261   : > { %v3371_v63 = vsel %vm3364_vm8, %v3370_v62, 0.0 }
0x2262   : > { %3372 = vadd.xlane.f32.xlu1 %v3371_v63 }
0x22ef   : > { %v3373_v7 = vpop.xlane.xlu1 %3372 }
0x22f0   : > { %v3374_v8 = vmul.f32 0.03125, %v3373_v7 }
0x22f2   : > { %v3375_v9 = vadd.f32 1e-05, %v3374_v8 }
0x22f4   : > { %4135 = vrsqrt.f32 %v3375_v9 }
0x22fe   : > { %v4136_v10 = vpop.eup %4135 }
0x22ff   : > { %v3377_v12 = vmul.f32 %v4136_v10, %v3369_v61 }
0x2301   : > { %v3378_v14 = vmul.f32 %v3377_v12, %v3362_v11 }
0x2303   : > { %v3379_v3 = vadd.f32 %v3378_v14, %v3363_v13 }
0x2305   : > { %3940 = vmatmul.mubr.msk.f32.vlgmr.msra.gmra.mrb[22].mxu0 %vm799_vm3, %v3379_v3 }
0x23d8   : > { %v3453_v15 = vpop.f32.mrb[22].mxu0 }
0x23d9   : > { %v3457_v16 = vmul.f32 %v3453_v15, %v3453_v15  ;;  %v3941_v27 = vpop.f32.mrb[23].mxu0 }
0x23db   : > { %v3458_v17 = vsel %vm3364_vm8, %v3457_v16, 0.0 }
0x23dc   : > { %3459 = vadd.xlane.f32.xlu1 %v3458_v17 }
0x2469   : > { %v3460_v18 = vpop.xlane.xlu1 %3459 }
0x246a   : > { %4137 = vrsqrt.f32 %v3460_v18 }
0x2474   : > { %v4138_v20 = vpop.eup %4137 }
0x2475   : > { %v3462_v21 = vmul.f32 %v4138_v20, %v3453_v15 }
0x2477   : > { %3463 = vst.msk [vmem:[%s621_s3] sm:$0x1] %vm3364_vm8, %v3462_v21 }
0x2478   : > { %4152 = shalt.err (!%p4149_p3)
}
0x2479   : > { %s4153_s25 = scalar_lea.hbm %s4915_s28, 16  ;;  %s4157_s27 = scalar_lea.hbm %s5020_s26, 32 }
0x247a   : > { %p4154_p4 = scmp.ne.s32.totalorder %s4915_s28, %s4153_s25  ;;  %p4158_p9 = scmp.lt.u32.totalorder %s4915_s28, %s5020_s26 }
0x247b   : > { %p4159_p10 = scmp.lt.u32.totalorder %s4157_s27, %s4153_s25  ;;  %p4161_p12 = scmp.lt.u32.totalorder %s4153_s25, %s4915_s28 }
0x247c   : > { %p4155_p7 = pnand %p4154_p4, %p4361_p5 }
0x247d   : > { %p4160_p11 = por %p4159_p10, %p4158_p9 }
0x247e   : > { %p4156_p8 = pneg %p4155_p7 }
0x247f   : > { %p4162_p13 = por %p4161_p12, %p4160_p11 }
0x2481   : > { %p4163_p0 = pnand %p4162_p13, %p4156_p8 }
0x2483   : > { %4166 = shalt.err (!%p4163_p0)
}
0x2484   : > { %4032 = dma.vmem_to_hbm [thread:$0]  (%p4361_p5), %s4917_s23, 16, %s4915_s28, %s3465_s24  }
0x2485 PF: > { %s5021_s1 = sld [smem:[#allocation7_spill]]  ;;  %s5022_s30 = sld [smem:[#allocation5_spill]] }
0x248b   : > { %p4038_p1 = scmp.ge.s32.totalorder %s5021_s1, 2  ;;  %s3489_s29 = sand.u32 1, %s5022_s30  }
0x248c   : > { %s3490_s3 = scalar_lea.sflag [#allocation3], %s3489_s29 }
0x248d   : > { %p4035_p2 = pnand %p4038_p1, %p4365_p6 }
0x248f   : > { %4184 = dma.done.wait (!%p4035_p2), %s3490_s3, 16  }
0x2490   : > { %4186 = vsyncadd (!%p4035_p2), %s3490_s3, 4294967280  ;;  %s5024_s24 = sld [smem:[#allocation8_spill]]  ;;  %s5025_s25 = sld [smem:[#allocation6_spill]] }
0x2491   : > { %s5026_s23 = sld [smem:[#allocation9_spill]]  ;;  %s5027_s1 = smov %s4193_s22 }
0x2496   : > { %p30_p3 = scmp.ge.s32.totalorder %s5024_s24, 4   ;;  %s5028_s22 = smov %s5025_s25 }
0x2498   :  { %32 = sbr.rel (!%p30_p3) target bundleno = 10 (0xa), region = 147 }
0x249f   :  { %3494 = vsyncpa [#allocation3], 1 }
0x24a0   :  { %3496 = vsyncpa [#allocation3 + $0x1], 1 }

</bundles_post_ra>
